<compile_context>
chip_gen: v6e
topology: v6e:2x2x1
jax: 0.10.0
libtpu: 0.0.40
codegen_flags: <defaults>
</compile_context>

<pallas_src>
import functools

import jax
import jax.numpy as jnp
from jax import lax
from jax.experimental import pallas as pl
from jax.experimental.pallas import tpu as pltpu


def _layer_norm(x, gamma, beta, eps):
    mu = jnp.mean(x, axis=-1, keepdims=True)
    xc = x - mu
    var = jnp.mean(xc * xc, axis=-1, keepdims=True)
    return xc * lax.rsqrt(var + eps) * gamma + beta


def _gelu_tanh(x):
    # TODO(synk): PyTorch's default nn.GELU is the exact erf form; we use the
    # tanh approximation (max abs deviation ~3e-3) because tanh is guaranteed
    # to lower through Mosaic and runs on the EUP.
    c = 0.7978845608028654  # sqrt(2/pi)
    return 0.5 * x * (1.0 + jnp.tanh(c * (x + 0.044715 * x * x * x)))


def _attn_block_kernel(x_ref, g1_ref, b1_ref, wqkv_ref, wo_ref, bo_ref,
                       g2_ref, b2_ref, w1_ref, bf1_ref, w2_ref, bf2_ref,
                       o_ref, *, heads, dim_head, scale, eps, b_tile, n):
    dim = x_ref.shape[-1]
    inner = heads * dim_head
    m = b_tile * n

    # Collapse (b_tile, n) into one M axis so LN / QKV / proj / FFN matmuls see
    # a tall M instead of M = n.
    x = x_ref[...].reshape(m, dim).astype(jnp.float32)

    # ---- PreNorm 1 + Attention ----
    xn = _layer_norm(x, g1_ref[...].astype(jnp.float32),
                     b1_ref[...].astype(jnp.float32), eps)
    # bf16 operands, f32 accumulation (single-pass MXU).
    qkv = jnp.dot(xn.astype(jnp.bfloat16), wqkv_ref[...].astype(jnp.bfloat16),
                  preferred_element_type=jnp.float32)            # (m, 3*inner) f32

    # Hoist the three inner-wide q/k/v slabs once (lane-aligned slices of qkv);
    # fold the softmax scale into q before the bf16 cast.
    q_all = (qkv[:, :inner] * scale).astype(jnp.bfloat16)
    k_all = qkv[:, inner:2 * inner].astype(jnp.bfloat16)
    v_all = qkv[:, 2 * inner:].astype(jnp.bfloat16)

    # Per-sequence, per-head attention (static unroll; tiny shapes).  Heads are
    # concatenated so the output projection is a single K=inner matmul.
    # TODO(synk): for large n (real Hist2ST spot counts) tile this over KV with
    # online-softmax scratch instead of materializing the (n, n) scores.
    seq_outs = []
    for bt in range(b_tile):
        r0 = bt * n
        q_s = q_all[r0:r0 + n]
        k_s = k_all[r0:r0 + n]
        v_s = v_all[r0:r0 + n]
        head_outs = []
        for hh in range(heads):
            lo = hh * dim_head
            hi = lo + dim_head
            q_h = q_s[:, lo:hi]
            k_h = k_s[:, lo:hi]
            v_h = v_s[:, lo:hi]
            dots = lax.dot_general(q_h, k_h, (((1,), (1,)), ((), ())),
                                   preferred_element_type=jnp.float32)  # (n, n)
            dots = dots - jnp.max(dots, axis=-1, keepdims=True)
            e = jnp.exp(dots)
            inv = pl.reciprocal(jnp.sum(e, axis=-1, keepdims=True), approx=True)
            attn = (e * inv).astype(jnp.bfloat16)
            head_outs.append(jnp.dot(attn, v_h,
                                     preferred_element_type=jnp.float32))
        seq_outs.append(jnp.concatenate(head_outs, axis=-1))     # (n, inner)
    attn_cat = jnp.concatenate(seq_outs, axis=0)                 # (m, inner)

    attn_proj = jnp.dot(attn_cat.astype(jnp.bfloat16),
                        wo_ref[...].astype(jnp.bfloat16),
                        preferred_element_type=jnp.float32)      # (m, dim)
    x1 = x + attn_proj + bo_ref[...].astype(jnp.float32)

    # ---- PreNorm 2 + FeedForward ----
    xn2 = _layer_norm(x1, g2_ref[...].astype(jnp.float32),
                      b2_ref[...].astype(jnp.float32), eps)
    h1 = jnp.dot(xn2.astype(jnp.bfloat16), w1_ref[...].astype(jnp.bfloat16),
                 preferred_element_type=jnp.float32) + bf1_ref[...].astype(jnp.float32)
    h1 = _gelu_tanh(h1)
    y = jnp.dot(h1.astype(jnp.bfloat16), w2_ref[...].astype(jnp.bfloat16),
                preferred_element_type=jnp.float32) + bf2_ref[...].astype(jnp.float32)

    o_ref[...] = (x1 + y).reshape(b_tile, n, dim).astype(o_ref.dtype)


def _pick_b_tile(b, n, target_rows):
    """Largest divisor of b so that b_tile * n <= target_rows (>= 1)."""
    best = 1
    for t in range(1, b + 1):
        if b % t == 0 and t * n <= target_rows:
            best = t
    return best


def attn_block(x, params, *, heads, dim_head, eps=1e-5, target_rows=256):
    """JAX/Pallas equivalent of attn_block(dim, heads, dim_head, mlp_dim)(x)."""
    b, n, dim = x.shape
    inner = heads * dim_head
    mlp_dim = params["w_ff1"].shape[1]
    scale = float(dim_head) ** -0.5

    b_tile = _pick_b_tile(b, n, target_rows)   # M = b_tile * n rows per grid step
    grid = (b // b_tile,)

    # Present 1-D params as (1, C) so every operand has a lane-mapped last dim.
    g1 = params["ln1_g"].reshape(1, dim)
    b1 = params["ln1_b"].reshape(1, dim)
    wqkv = params["w_qkv"]                 # (dim, 3*inner)
    wo = params["w_out"]                   # (inner, dim)
    bo = params["b_out"].reshape(1, dim)
    g2 = params["ln2_g"].reshape(1, dim)
    b2 = params["ln2_b"].reshape(1, dim)
    w1 = params["w_ff1"]                   # (dim, mlp_dim)
    bf1 = params["b_ff1"].reshape(1, mlp_dim)
    w2 = params["w_ff2"]                   # (mlp_dim, dim)
    bf2 = params["b_ff2"].reshape(1, dim)
    weights = (g1, b1, wqkv, wo, bo, g2, b2, w1, bf1, w2, bf2)

    # TODO(synk): for large dim/mlp_dim mark the constant-index weight specs
    # pipeline_mode=pl.Buffered(1) (no need to double-buffer them).
    def full_spec(a):
        nd = a.ndim
        return pl.BlockSpec(a.shape, lambda i, _nd=nd: (0,) * _nd)

    kernel = functools.partial(_attn_block_kernel, heads=heads,
                               dim_head=dim_head, scale=scale, eps=eps,
                               b_tile=b_tile, n=n)

    m = b_tile * n
    itemsize = x.dtype.itemsize
    weight_bytes = sum(int(w.size) * w.dtype.itemsize for w in weights)

    # Advisory cost estimate (weights fetched once: constant index maps).
    flops_per_b = 2 * n * dim * 3 * inner            # qkv projection
    flops_per_b += 2 * heads * n * n * dim_head * 2  # q@k.T and attn@v
    flops_per_b += 2 * n * inner * dim               # output projection
    flops_per_b += 2 * n * dim * mlp_dim * 2         # two FF matmuls
    trans_per_b = heads * n * n + n * mlp_dim + 2 * n
    bytes_accessed = 2 * b * n * dim * itemsize + weight_bytes

    # VMEM budget: double-buffered in/out tiles + (double-buffered) weights +
    # f32 working set, with 2x headroom, capped to fit v7x's 64 MiB.
    io_bytes = 2 * 2 * m * dim * itemsize
    work_bytes = 4 * (m * (4 * dim + 5 * inner + 2 * mlp_dim) + 4 * n * n)
    vmem_limit = int(min(64 << 20,
                         max(8 << 20,
                             2 * (io_bytes + 2 * weight_bytes + work_bytes))))

    return pl.pallas_call(
        kernel,
        out_shape=jax.ShapeDtypeStruct((b, n, dim), x.dtype),
        grid_spec=pltpu.PrefetchScalarGridSpec(
            num_scalar_prefetch=0,
            grid=grid,
            in_specs=[pl.BlockSpec((b_tile, n, dim), lambda i: (i, 0, 0))]
                     + [full_spec(w) for w in weights],
            out_specs=pl.BlockSpec((b_tile, n, dim), lambda i: (i, 0, 0)),
        ),
        compiler_params=pltpu.CompilerParams(
            dimension_semantics=("parallel",),
            vmem_limit_bytes=vmem_limit,
        ),
        cost_estimate=pl.CostEstimate(
            flops=b * flops_per_b,
            transcendentals=b * trans_per_b,
            bytes_accessed=bytes_accessed,
        ),
    )(x, *weights)


def attn_block_ref(x, params, *, heads, dim_head, eps=1e-5,
                   matmul_dtype=None, approx_gelu=False):
    """Pure-JAX reference.

    matmul_dtype=None / approx_gelu=False -> exact f32 (PyTorch semantics,
    erf GELU).  matmul_dtype=jnp.bfloat16 / approx_gelu=True -> mirrors the
    kernel's numeric choices (structural check with tight tolerance).
    """
    b, n, dim = x.shape
    inner = heads * dim_head
    scale = float(dim_head) ** -0.5
    prec = lax.Precision.HIGHEST if matmul_dtype is None else None

    def cast(t):
        return t if matmul_dtype is None else t.astype(matmul_dtype)

    def mm(a, w):
        return jnp.dot(cast(a), cast(w), preferred_element_type=jnp.float32,
                       precision=prec)

    def ln(t, g, bb):
        mu = jnp.mean(t, -1, keepdims=True)
        var = jnp.mean((t - mu) ** 2, -1, keepdims=True)
        return (t - mu) * lax.rsqrt(var + eps) * g + bb

    xn = ln(x, params["ln1_g"], params["ln1_b"])
    qkv = mm(xn, params["w_qkv"])
    q, k, v = jnp.split(qkv, 3, axis=-1)
    q = q * scale                                  # same scale-folding as kernel

    def to_heads(t):
        return t.reshape(b, n, heads, dim_head).transpose(0, 2, 1, 3)

    q, k, v = map(to_heads, (q, k, v))
    dots = jnp.einsum("bhid,bhjd->bhij", cast(q), cast(k),
                      preferred_element_type=jnp.float32, precision=prec)
    attn = jax.nn.softmax(dots, axis=-1)
    out = jnp.einsum("bhij,bhjd->bhid", cast(attn), cast(v),
                     preferred_element_type=jnp.float32, precision=prec)
    out = out.transpose(0, 2, 1, 3).reshape(b, n, inner)
    x1 = x + mm(out, params["w_out"]) + params["b_out"]

    xn2 = ln(x1, params["ln2_g"], params["ln2_b"])
    h = mm(xn2, params["w_ff1"]) + params["b_ff1"]
    h = _gelu_tanh(h) if approx_gelu else jax.nn.gelu(h, approximate=False)
    return x1 + mm(h, params["w_ff2"]) + params["b_ff2"]


if __name__ == "__main__":
    key = jax.random.PRNGKey(0)
    ks = jax.random.split(key, 12)

    batch, seq = 2, 8
    dim, heads, dim_head, mlp_dim = 64, 4, 32, 128
    inner = heads * dim_head

    x = jax.random.normal(ks[0], (batch, seq, dim), dtype=jnp.float32)
    params = {
        "ln1_g": 1.0 + 0.1 * jax.random.normal(ks[1], (dim,), jnp.float32),
        "ln1_b": 0.1 * jax.random.normal(ks[2], (dim,), jnp.float32),
        "w_qkv": 0.08 * jax.random.normal(ks[3], (dim, 3 * inner), jnp.float32),
        "w_out": 0.08 * jax.random.normal(ks[4], (inner, dim), jnp.float32),
        "b_out": 0.05 * jax.random.normal(ks[5], (dim,), jnp.float32),
        "ln2_g": 1.0 + 0.1 * jax.random.normal(ks[6], (dim,), jnp.float32),
        "ln2_b": 0.1 * jax.random.normal(ks[7], (dim,), jnp.float32),
        "w_ff1": 0.08 * jax.random.normal(ks[8], (dim, mlp_dim), jnp.float32),
        "b_ff1": 0.05 * jax.random.normal(ks[9], (mlp_dim,), jnp.float32),
        "w_ff2": 0.08 * jax.random.normal(ks[10], (mlp_dim, dim), jnp.float32),
        "b_ff2": 0.05 * jax.random.normal(ks[11], (dim,), jnp.float32),
    }

    out = attn_block(x, params, heads=heads, dim_head=dim_head)
    out = jax.block_until_ready(out)

    # Structural check against a reference mirroring the kernel's bf16 matmul
    # casting (tight), plus a semantic check against the exact-f32 / erf-GELU
    # PyTorch-equivalent reference (tolerance widened for bf16 matmuls).
    ref_matched = attn_block_ref(x, params, heads=heads, dim_head=dim_head,
                                 matmul_dtype=jnp.bfloat16, approx_gelu=True)
    ref_exact = attn_block_ref(x, params, heads=heads, dim_head=dim_head)
    ref_matched = jax.block_until_ready(ref_matched)
    ref_exact = jax.block_until_ready(ref_exact)

    assert out.shape == ref_exact.shape and out.dtype == ref_exact.dtype
    err_matched = float(jnp.max(jnp.abs(out - ref_matched)))
    err_exact = float(jnp.max(jnp.abs(out - ref_exact)))
    assert err_matched < 1e-2, f"matched-ref max abs err {err_matched}"
    assert err_exact < 5e-2, f"exact-ref max abs err {err_exact}"
    print("KERNEL_OK")
</pallas_src>

<mosaic_0001>
module attributes {stable_mosaic.version = 11 : i64} {
  func.func @_attn_block_kernel(%arg0: i32, %arg1: memref<2x8x64xf32, #tpu.memory_space<vmem>>, %arg2: memref<1x64xf32, #tpu.memory_space<vmem>>, %arg3: memref<1x64xf32, #tpu.memory_space<vmem>>, %arg4: memref<64x384xf32, #tpu.memory_space<vmem>>, %arg5: memref<128x64xf32, #tpu.memory_space<vmem>>, %arg6: memref<1x64xf32, #tpu.memory_space<vmem>>, %arg7: memref<1x64xf32, #tpu.memory_space<vmem>>, %arg8: memref<1x64xf32, #tpu.memory_space<vmem>>, %arg9: memref<64x128xf32, #tpu.memory_space<vmem>>, %arg10: memref<1x128xf32, #tpu.memory_space<vmem>>, %arg11: memref<128x64xf32, #tpu.memory_space<vmem>>, %arg12: memref<1x64xf32, #tpu.memory_space<vmem>>, %arg13: memref<2x8x64xf32, #tpu.memory_space<vmem>>) attributes {dimension_semantics = [#tpu.dimension_semantics<parallel>], iteration_bounds = array<i64: 1>, scalar_prefetch = 0 : i64, scratch_operands = 0 : i64, tpu.core_type = #tpu.core_type<tc>, window_params = [{transform_indices = @transform_0, window_bounds = array<i64: 2, 8, 64>}, {pipeline_mode = #tpu.pipeline_mode<synchronous>, transform_indices = @transform_1, window_bounds = array<i64: 1, 64>}, {pipeline_mode = #tpu.pipeline_mode<synchronous>, transform_indices = @transform_2, window_bounds = array<i64: 1, 64>}, {pipeline_mode = #tpu.pipeline_mode<synchronous>, transform_indices = @transform_3, window_bounds = array<i64: 64, 384>}, {pipeline_mode = #tpu.pipeline_mode<synchronous>, transform_indices = @transform_4, window_bounds = array<i64: 128, 64>}, {pipeline_mode = #tpu.pipeline_mode<synchronous>, transform_indices = @transform_5, window_bounds = array<i64: 1, 64>}, {pipeline_mode = #tpu.pipeline_mode<synchronous>, transform_indices = @transform_6, window_bounds = array<i64: 1, 64>}, {pipeline_mode = #tpu.pipeline_mode<synchronous>, transform_indices = @transform_7, window_bounds = array<i64: 1, 64>}, {pipeline_mode = #tpu.pipeline_mode<synchronous>, transform_indices = @transform_8, window_bounds = array<i64: 64, 128>}, {pipeline_mode = #tpu.pipeline_mode<synchronous>, transform_indices = @transform_9, window_bounds = array<i64: 1, 128>}, {pipeline_mode = #tpu.pipeline_mode<synchronous>, transform_indices = @transform_10, window_bounds = array<i64: 128, 64>}, {pipeline_mode = #tpu.pipeline_mode<synchronous>, transform_indices = @transform_11, window_bounds = array<i64: 1, 64>}, {transform_indices = @transform_12, window_bounds = array<i64: 2, 8, 64>}]} {
    %c0 = arith.constant 0 : index
    %c0_0 = arith.constant 0 : index
    %c0_1 = arith.constant 0 : index
    %0 = vector.load %arg1[%c0, %c0_0, %c0_1] : memref<2x8x64xf32, #tpu.memory_space<vmem>>, vector<2x8x64xf32>
    %1 = vector.shape_cast %0 : vector<2x8x64xf32> to vector<16x64xf32>
    %c0_2 = arith.constant 0 : index
    %c0_3 = arith.constant 0 : index
    %2 = vector.load %arg2[%c0_2, %c0_3] : memref<1x64xf32, #tpu.memory_space<vmem>>, vector<1x64xf32>
    %c0_4 = arith.constant 0 : index
    %c0_5 = arith.constant 0 : index
    %3 = vector.load %arg3[%c0_4, %c0_5] : memref<1x64xf32, #tpu.memory_space<vmem>>, vector<1x64xf32>
    %cst = arith.constant dense<0.000000e+00> : vector<16xf32>
    %4 = vector.multi_reduction <add>, %1, %cst [1] : vector<16x64xf32> to vector<16xf32>
    %5 = vector.shape_cast %4 : vector<16xf32> to vector<16x1xf32>
    %cst_6 = arith.constant 6.400000e+01 : f32
    %6 = vector.broadcast %cst_6 : f32 to vector<16x1xf32>
    %7 = arith.divf %5, %6 : vector<16x1xf32>
    %8 = vector.broadcast %7 : vector<16x1xf32> to vector<16x64xf32>
    %9 = arith.subf %1, %8 : vector<16x64xf32>
    %10 = arith.mulf %9, %9 : vector<16x64xf32>
    %cst_7 = arith.constant dense<0.000000e+00> : vector<16xf32>
    %11 = vector.multi_reduction <add>, %10, %cst_7 [1] : vector<16x64xf32> to vector<16xf32>
    %12 = vector.shape_cast %11 : vector<16xf32> to vector<16x1xf32>
    %cst_8 = arith.constant 6.400000e+01 : f32
    %13 = vector.broadcast %cst_8 : f32 to vector<16x1xf32>
    %14 = arith.divf %12, %13 : vector<16x1xf32>
    %cst_9 = arith.constant 9.99999974E-6 : f32
    %15 = vector.broadcast %cst_9 : f32 to vector<16x1xf32>
    %16 = arith.addf %14, %15 : vector<16x1xf32>
    %17 = math.rsqrt %16 : vector<16x1xf32>
    %18 = vector.broadcast %17 : vector<16x1xf32> to vector<16x64xf32>
    %19 = arith.mulf %9, %18 : vector<16x64xf32>
    %20 = vector.broadcast %2 : vector<1x64xf32> to vector<16x64xf32>
    %21 = arith.mulf %19, %20 : vector<16x64xf32>
    %22 = vector.broadcast %3 : vector<1x64xf32> to vector<16x64xf32>
    %23 = arith.addf %21, %22 : vector<16x64xf32>
    %24 = arith.truncf %23 : vector<16x64xf32> to vector<16x64xbf16>
    %c0_10 = arith.constant 0 : index
    %c0_11 = arith.constant 0 : index
    %25 = vector.load %arg4[%c0_10, %c0_11] : memref<64x384xf32, #tpu.memory_space<vmem>>, vector<64x384xf32>
    %26 = arith.truncf %25 : vector<64x384xf32> to vector<64x384xbf16>
    %cst_12 = arith.constant dense<0.000000e+00> : vector<16x384xf32>
    %27 = tpu.matmul %24, %26, %cst_12 {dimension_numbers = #tpu.dot_dimension_numbers<[1], [0], [0], [1], [0, 0, 1, 1], [], []>} : vector<16x64xbf16>, vector<64x384xbf16>, vector<16x384xf32> -> vector<16x384xf32>
    %28 = vector.extract_strided_slice %27 {offsets = [0, 0], sizes = [16, 128], strides = [1, 1]} : vector<16x384xf32> to vector<16x128xf32>
    %cst_13 = arith.constant 0.176776692 : f32
    %29 = vector.broadcast %cst_13 : f32 to vector<16x128xf32>
    %30 = arith.mulf %28, %29 : vector<16x128xf32>
    %31 = arith.truncf %30 : vector<16x128xf32> to vector<16x128xbf16>
    %32 = vector.extract_strided_slice %27 {offsets = [0, 128], sizes = [16, 128], strides = [1, 1]} : vector<16x384xf32> to vector<16x128xf32>
    %33 = arith.truncf %32 : vector<16x128xf32> to vector<16x128xbf16>
    %34 = vector.extract_strided_slice %27 {offsets = [0, 256], sizes = [16, 128], strides = [1, 1]} : vector<16x384xf32> to vector<16x128xf32>
    %35 = arith.truncf %34 : vector<16x128xf32> to vector<16x128xbf16>
    %36 = vector.extract_strided_slice %31 {offsets = [0, 0], sizes = [8, 128], strides = [1, 1]} : vector<16x128xbf16> to vector<8x128xbf16>
    %37 = vector.extract_strided_slice %33 {offsets = [0, 0], sizes = [8, 128], strides = [1, 1]} : vector<16x128xbf16> to vector<8x128xbf16>
    %38 = vector.extract_strided_slice %35 {offsets = [0, 0], sizes = [8, 128], strides = [1, 1]} : vector<16x128xbf16> to vector<8x128xbf16>
    %39 = vector.extract_strided_slice %36 {offsets = [0, 0], sizes = [8, 32], strides = [1, 1]} : vector<8x128xbf16> to vector<8x32xbf16>
    %40 = vector.extract_strided_slice %37 {offsets = [0, 0], sizes = [8, 32], strides = [1, 1]} : vector<8x128xbf16> to vector<8x32xbf16>
    %41 = vector.extract_strided_slice %38 {offsets = [0, 0], sizes = [8, 32], strides = [1, 1]} : vector<8x128xbf16> to vector<8x32xbf16>
    %cst_14 = arith.constant dense<0.000000e+00> : vector<8x8xf32>
    %42 = tpu.matmul %39, %40, %cst_14 {dimension_numbers = #tpu.dot_dimension_numbers<[1], [1], [0], [0], [0, 0, 1, 0], [], []>} : vector<8x32xbf16>, vector<8x32xbf16>, vector<8x8xf32> -> vector<8x8xf32>
    %cst_15 = arith.constant dense<0xFF800000> : vector<8xf32>
    %43 = vector.multi_reduction <maximumf>, %42, %cst_15 [1] : vector<8x8xf32> to vector<8xf32>
    %44 = vector.shape_cast %43 : vector<8xf32> to vector<8x1xf32>
    %45 = vector.broadcast %44 : vector<8x1xf32> to vector<8x8xf32>
    %46 = arith.subf %42, %45 : vector<8x8xf32>
    %47 = math.exp %46 : vector<8x8xf32>
    %cst_16 = arith.constant dense<0.000000e+00> : vector<8xf32>
    %48 = vector.multi_reduction <add>, %47, %cst_16 [1] : vector<8x8xf32> to vector<8xf32>
    %49 = vector.shape_cast %48 : vector<8xf32> to vector<8x1xf32>
    %50 = tpu.reciprocal %49 {approx = true} : vector<8x1xf32> -> vector<8x1xf32>
    %51 = vector.broadcast %50 : vector<8x1xf32> to vector<8x8xf32>
    %52 = arith.mulf %47, %51 : vector<8x8xf32>
    %53 = arith.truncf %52 : vector<8x8xf32> to vector<8x8xbf16>
    %cst_17 = arith.constant dense<0.000000e+00> : vector<8x32xf32>
    %54 = tpu.matmul %53, %41, %cst_17 {dimension_numbers = #tpu.dot_dimension_numbers<[1], [0], [0], [1], [0, 0, 1, 1], [], []>} : vector<8x8xbf16>, vector<8x32xbf16>, vector<8x32xf32> -> vector<8x32xf32>
    %55 = vector.extract_strided_slice %36 {offsets = [0, 32], sizes = [8, 32], strides = [1, 1]} : vector<8x128xbf16> to vector<8x32xbf16>
    %56 = vector.extract_strided_slice %37 {offsets = [0, 32], sizes = [8, 32], strides = [1, 1]} : vector<8x128xbf16> to vector<8x32xbf16>
    %57 = vector.extract_strided_slice %38 {offsets = [0, 32], sizes = [8, 32], strides = [1, 1]} : vector<8x128xbf16> to vector<8x32xbf16>
    %cst_18 = arith.constant dense<0.000000e+00> : vector<8x8xf32>
    %58 = tpu.matmul %55, %56, %cst_18 {dimension_numbers = #tpu.dot_dimension_numbers<[1], [1], [0], [0], [0, 0, 1, 0], [], []>} : vector<8x32xbf16>, vector<8x32xbf16>, vector<8x8xf32> -> vector<8x8xf32>
    %cst_19 = arith.constant dense<0xFF800000> : vector<8xf32>
    %59 = vector.multi_reduction <maximumf>, %58, %cst_19 [1] : vector<8x8xf32> to vector<8xf32>
    %60 = vector.shape_cast %59 : vector<8xf32> to vector<8x1xf32>
    %61 = vector.broadcast %60 : vector<8x1xf32> to vector<8x8xf32>
    %62 = arith.subf %58, %61 : vector<8x8xf32>
    %63 = math.exp %62 : vector<8x8xf32>
    %cst_20 = arith.constant dense<0.000000e+00> : vector<8xf32>
    %64 = vector.multi_reduction <add>, %63, %cst_20 [1] : vector<8x8xf32> to vector<8xf32>
    %65 = vector.shape_cast %64 : vector<8xf32> to vector<8x1xf32>
    %66 = tpu.reciprocal %65 {approx = true} : vector<8x1xf32> -> vector<8x1xf32>
    %67 = vector.broadcast %66 : vector<8x1xf32> to vector<8x8xf32>
    %68 = arith.mulf %63, %67 : vector<8x8xf32>
    %69 = arith.truncf %68 : vector<8x8xf32> to vector<8x8xbf16>
    %cst_21 = arith.constant dense<0.000000e+00> : vector<8x32xf32>
    %70 = tpu.matmul %69, %57, %cst_21 {dimension_numbers = #tpu.dot_dimension_numbers<[1], [0], [0], [1], [0, 0, 1, 1], [], []>} : vector<8x8xbf16>, vector<8x32xbf16>, vector<8x32xf32> -> vector<8x32xf32>
    %71 = vector.extract_strided_slice %36 {offsets = [0, 64], sizes = [8, 32], strides = [1, 1]} : vector<8x128xbf16> to vector<8x32xbf16>
    %72 = vector.extract_strided_slice %37 {offsets = [0, 64], sizes = [8, 32], strides = [1, 1]} : vector<8x128xbf16> to vector<8x32xbf16>
    %73 = vector.extract_strided_slice %38 {offsets = [0, 64], sizes = [8, 32], strides = [1, 1]} : vector<8x128xbf16> to vector<8x32xbf16>
    %cst_22 = arith.constant dense<0.000000e+00> : vector<8x8xf32>
    %74 = tpu.matmul %71, %72, %cst_22 {dimension_numbers = #tpu.dot_dimension_numbers<[1], [1], [0], [0], [0, 0, 1, 0], [], []>} : vector<8x32xbf16>, vector<8x32xbf16>, vector<8x8xf32> -> vector<8x8xf32>
    %cst_23 = arith.constant dense<0xFF800000> : vector<8xf32>
    %75 = vector.multi_reduction <maximumf>, %74, %cst_23 [1] : vector<8x8xf32> to vector<8xf32>
    %76 = vector.shape_cast %75 : vector<8xf32> to vector<8x1xf32>
    %77 = vector.broadcast %76 : vector<8x1xf32> to vector<8x8xf32>
    %78 = arith.subf %74, %77 : vector<8x8xf32>
    %79 = math.exp %78 : vector<8x8xf32>
    %cst_24 = arith.constant dense<0.000000e+00> : vector<8xf32>
    %80 = vector.multi_reduction <add>, %79, %cst_24 [1] : vector<8x8xf32> to vector<8xf32>
    %81 = vector.shape_cast %80 : vector<8xf32> to vector<8x1xf32>
    %82 = tpu.reciprocal %81 {approx = true} : vector<8x1xf32> -> vector<8x1xf32>
    %83 = vector.broadcast %82 : vector<8x1xf32> to vector<8x8xf32>
    %84 = arith.mulf %79, %83 : vector<8x8xf32>
    %85 = arith.truncf %84 : vector<8x8xf32> to vector<8x8xbf16>
    %cst_25 = arith.constant dense<0.000000e+00> : vector<8x32xf32>
    %86 = tpu.matmul %85, %73, %cst_25 {dimension_numbers = #tpu.dot_dimension_numbers<[1], [0], [0], [1], [0, 0, 1, 1], [], []>} : vector<8x8xbf16>, vector<8x32xbf16>, vector<8x32xf32> -> vector<8x32xf32>
    %87 = vector.extract_strided_slice %36 {offsets = [0, 96], sizes = [8, 32], strides = [1, 1]} : vector<8x128xbf16> to vector<8x32xbf16>
    %88 = vector.extract_strided_slice %37 {offsets = [0, 96], sizes = [8, 32], strides = [1, 1]} : vector<8x128xbf16> to vector<8x32xbf16>
    %89 = vector.extract_strided_slice %38 {offsets = [0, 96], sizes = [8, 32], strides = [1, 1]} : vector<8x128xbf16> to vector<8x32xbf16>
    %cst_26 = arith.constant dense<0.000000e+00> : vector<8x8xf32>
    %90 = tpu.matmul %87, %88, %cst_26 {dimension_numbers = #tpu.dot_dimension_numbers<[1], [1], [0], [0], [0, 0, 1, 0], [], []>} : vector<8x32xbf16>, vector<8x32xbf16>, vector<8x8xf32> -> vector<8x8xf32>
    %cst_27 = arith.constant dense<0xFF800000> : vector<8xf32>
    %91 = vector.multi_reduction <maximumf>, %90, %cst_27 [1] : vector<8x8xf32> to vector<8xf32>
    %92 = vector.shape_cast %91 : vector<8xf32> to vector<8x1xf32>
    %93 = vector.broadcast %92 : vector<8x1xf32> to vector<8x8xf32>
    %94 = arith.subf %90, %93 : vector<8x8xf32>
    %95 = math.exp %94 : vector<8x8xf32>
    %cst_28 = arith.constant dense<0.000000e+00> : vector<8xf32>
    %96 = vector.multi_reduction <add>, %95, %cst_28 [1] : vector<8x8xf32> to vector<8xf32>
    %97 = vector.shape_cast %96 : vector<8xf32> to vector<8x1xf32>
    %98 = tpu.reciprocal %97 {approx = true} : vector<8x1xf32> -> vector<8x1xf32>
    %99 = vector.broadcast %98 : vector<8x1xf32> to vector<8x8xf32>
    %100 = arith.mulf %95, %99 : vector<8x8xf32>
    %101 = arith.truncf %100 : vector<8x8xf32> to vector<8x8xbf16>
    %cst_29 = arith.constant dense<0.000000e+00> : vector<8x32xf32>
    %102 = tpu.matmul %101, %89, %cst_29 {dimension_numbers = #tpu.dot_dimension_numbers<[1], [0], [0], [1], [0, 0, 1, 1], [], []>} : vector<8x8xbf16>, vector<8x32xbf16>, vector<8x32xf32> -> vector<8x32xf32>
    %103 = tpu.concatenate %54, %70, %86, %102 in 1 : vector<8x32xf32>, vector<8x32xf32>, vector<8x32xf32>, vector<8x32xf32> -> vector<8x128xf32>
    %104 = vector.extract_strided_slice %31 {offsets = [8, 0], sizes = [8, 128], strides = [1, 1]} : vector<16x128xbf16> to vector<8x128xbf16>
    %105 = vector.extract_strided_slice %33 {offsets = [8, 0], sizes = [8, 128], strides = [1, 1]} : vector<16x128xbf16> to vector<8x128xbf16>
    %106 = vector.extract_strided_slice %35 {offsets = [8, 0], sizes = [8, 128], strides = [1, 1]} : vector<16x128xbf16> to vector<8x128xbf16>
    %107 = vector.extract_strided_slice %104 {offsets = [0, 0], sizes = [8, 32], strides = [1, 1]} : vector<8x128xbf16> to vector<8x32xbf16>
    %108 = vector.extract_strided_slice %105 {offsets = [0, 0], sizes = [8, 32], strides = [1, 1]} : vector<8x128xbf16> to vector<8x32xbf16>
    %109 = vector.extract_strided_slice %106 {offsets = [0, 0], sizes = [8, 32], strides = [1, 1]} : vector<8x128xbf16> to vector<8x32xbf16>
    %cst_30 = arith.constant dense<0.000000e+00> : vector<8x8xf32>
    %110 = tpu.matmul %107, %108, %cst_30 {dimension_numbers = #tpu.dot_dimension_numbers<[1], [1], [0], [0], [0, 0, 1, 0], [], []>} : vector<8x32xbf16>, vector<8x32xbf16>, vector<8x8xf32> -> vector<8x8xf32>
    %cst_31 = arith.constant dense<0xFF800000> : vector<8xf32>
    %111 = vector.multi_reduction <maximumf>, %110, %cst_31 [1] : vector<8x8xf32> to vector<8xf32>
    %112 = vector.shape_cast %111 : vector<8xf32> to vector<8x1xf32>
    %113 = vector.broadcast %112 : vector<8x1xf32> to vector<8x8xf32>
    %114 = arith.subf %110, %113 : vector<8x8xf32>
    %115 = math.exp %114 : vector<8x8xf32>
    %cst_32 = arith.constant dense<0.000000e+00> : vector<8xf32>
    %116 = vector.multi_reduction <add>, %115, %cst_32 [1] : vector<8x8xf32> to vector<8xf32>
    %117 = vector.shape_cast %116 : vector<8xf32> to vector<8x1xf32>
    %118 = tpu.reciprocal %117 {approx = true} : vector<8x1xf32> -> vector<8x1xf32>
    %119 = vector.broadcast %118 : vector<8x1xf32> to vector<8x8xf32>
    %120 = arith.mulf %115, %119 : vector<8x8xf32>
    %121 = arith.truncf %120 : vector<8x8xf32> to vector<8x8xbf16>
    %cst_33 = arith.constant dense<0.000000e+00> : vector<8x32xf32>
    %122 = tpu.matmul %121, %109, %cst_33 {dimension_numbers = #tpu.dot_dimension_numbers<[1], [0], [0], [1], [0, 0, 1, 1], [], []>} : vector<8x8xbf16>, vector<8x32xbf16>, vector<8x32xf32> -> vector<8x32xf32>
    %123 = vector.extract_strided_slice %104 {offsets = [0, 32], sizes = [8, 32], strides = [1, 1]} : vector<8x128xbf16> to vector<8x32xbf16>
    %124 = vector.extract_strided_slice %105 {offsets = [0, 32], sizes = [8, 32], strides = [1, 1]} : vector<8x128xbf16> to vector<8x32xbf16>
    %125 = vector.extract_strided_slice %106 {offsets = [0, 32], sizes = [8, 32], strides = [1, 1]} : vector<8x128xbf16> to vector<8x32xbf16>
    %cst_34 = arith.constant dense<0.000000e+00> : vector<8x8xf32>
    %126 = tpu.matmul %123, %124, %cst_34 {dimension_numbers = #tpu.dot_dimension_numbers<[1], [1], [0], [0], [0, 0, 1, 0], [], []>} : vector<8x32xbf16>, vector<8x32xbf16>, vector<8x8xf32> -> vector<8x8xf32>
    %cst_35 = arith.constant dense<0xFF800000> : vector<8xf32>
    %127 = vector.multi_reduction <maximumf>, %126, %cst_35 [1] : vector<8x8xf32> to vector<8xf32>
    %128 = vector.shape_cast %127 : vector<8xf32> to vector<8x1xf32>
    %129 = vector.broadcast %128 : vector<8x1xf32> to vector<8x8xf32>
    %130 = arith.subf %126, %129 : vector<8x8xf32>
    %131 = math.exp %130 : vector<8x8xf32>
    %cst_36 = arith.constant dense<0.000000e+00> : vector<8xf32>
    %132 = vector.multi_reduction <add>, %131, %cst_36 [1] : vector<8x8xf32> to vector<8xf32>
    %133 = vector.shape_cast %132 : vector<8xf32> to vector<8x1xf32>
    %134 = tpu.reciprocal %133 {approx = true} : vector<8x1xf32> -> vector<8x1xf32>
    %135 = vector.broadcast %134 : vector<8x1xf32> to vector<8x8xf32>
    %136 = arith.mulf %131, %135 : vector<8x8xf32>
    %137 = arith.truncf %136 : vector<8x8xf32> to vector<8x8xbf16>
    %cst_37 = arith.constant dense<0.000000e+00> : vector<8x32xf32>
    %138 = tpu.matmul %137, %125, %cst_37 {dimension_numbers = #tpu.dot_dimension_numbers<[1], [0], [0], [1], [0, 0, 1, 1], [], []>} : vector<8x8xbf16>, vector<8x32xbf16>, vector<8x32xf32> -> vector<8x32xf32>
    %139 = vector.extract_strided_slice %104 {offsets = [0, 64], sizes = [8, 32], strides = [1, 1]} : vector<8x128xbf16> to vector<8x32xbf16>
    %140 = vector.extract_strided_slice %105 {offsets = [0, 64], sizes = [8, 32], strides = [1, 1]} : vector<8x128xbf16> to vector<8x32xbf16>
    %141 = vector.extract_strided_slice %106 {offsets = [0, 64], sizes = [8, 32], strides = [1, 1]} : vector<8x128xbf16> to vector<8x32xbf16>
    %cst_38 = arith.constant dense<0.000000e+00> : vector<8x8xf32>
    %142 = tpu.matmul %139, %140, %cst_38 {dimension_numbers = #tpu.dot_dimension_numbers<[1], [1], [0], [0], [0, 0, 1, 0], [], []>} : vector<8x32xbf16>, vector<8x32xbf16>, vector<8x8xf32> -> vector<8x8xf32>
    %cst_39 = arith.constant dense<0xFF800000> : vector<8xf32>
    %143 = vector.multi_reduction <maximumf>, %142, %cst_39 [1] : vector<8x8xf32> to vector<8xf32>
    %144 = vector.shape_cast %143 : vector<8xf32> to vector<8x1xf32>
    %145 = vector.broadcast %144 : vector<8x1xf32> to vector<8x8xf32>
    %146 = arith.subf %142, %145 : vector<8x8xf32>
    %147 = math.exp %146 : vector<8x8xf32>
    %cst_40 = arith.constant dense<0.000000e+00> : vector<8xf32>
    %148 = vector.multi_reduction <add>, %147, %cst_40 [1] : vector<8x8xf32> to vector<8xf32>
    %149 = vector.shape_cast %148 : vector<8xf32> to vector<8x1xf32>
    %150 = tpu.reciprocal %149 {approx = true} : vector<8x1xf32> -> vector<8x1xf32>
    %151 = vector.broadcast %150 : vector<8x1xf32> to vector<8x8xf32>
    %152 = arith.mulf %147, %151 : vector<8x8xf32>
    %153 = arith.truncf %152 : vector<8x8xf32> to vector<8x8xbf16>
    %cst_41 = arith.constant dense<0.000000e+00> : vector<8x32xf32>
    %154 = tpu.matmul %153, %141, %cst_41 {dimension_numbers = #tpu.dot_dimension_numbers<[1], [0], [0], [1], [0, 0, 1, 1], [], []>} : vector<8x8xbf16>, vector<8x32xbf16>, vector<8x32xf32> -> vector<8x32xf32>
    %155 = vector.extract_strided_slice %104 {offsets = [0, 96], sizes = [8, 32], strides = [1, 1]} : vector<8x128xbf16> to vector<8x32xbf16>
    %156 = vector.extract_strided_slice %105 {offsets = [0, 96], sizes = [8, 32], strides = [1, 1]} : vector<8x128xbf16> to vector<8x32xbf16>
    %157 = vector.extract_strided_slice %106 {offsets = [0, 96], sizes = [8, 32], strides = [1, 1]} : vector<8x128xbf16> to vector<8x32xbf16>
    %cst_42 = arith.constant dense<0.000000e+00> : vector<8x8xf32>
    %158 = tpu.matmul %155, %156, %cst_42 {dimension_numbers = #tpu.dot_dimension_numbers<[1], [1], [0], [0], [0, 0, 1, 0], [], []>} : vector<8x32xbf16>, vector<8x32xbf16>, vector<8x8xf32> -> vector<8x8xf32>
    %cst_43 = arith.constant dense<0xFF800000> : vector<8xf32>
    %159 = vector.multi_reduction <maximumf>, %158, %cst_43 [1] : vector<8x8xf32> to vector<8xf32>
    %160 = vector.shape_cast %159 : vector<8xf32> to vector<8x1xf32>
    %161 = vector.broadcast %160 : vector<8x1xf32> to vector<8x8xf32>
    %162 = arith.subf %158, %161 : vector<8x8xf32>
    %163 = math.exp %162 : vector<8x8xf32>
    %cst_44 = arith.constant dense<0.000000e+00> : vector<8xf32>
    %164 = vector.multi_reduction <add>, %163, %cst_44 [1] : vector<8x8xf32> to vector<8xf32>
    %165 = vector.shape_cast %164 : vector<8xf32> to vector<8x1xf32>
    %166 = tpu.reciprocal %165 {approx = true} : vector<8x1xf32> -> vector<8x1xf32>
    %167 = vector.broadcast %166 : vector<8x1xf32> to vector<8x8xf32>
    %168 = arith.mulf %163, %167 : vector<8x8xf32>
    %169 = arith.truncf %168 : vector<8x8xf32> to vector<8x8xbf16>
    %cst_45 = arith.constant dense<0.000000e+00> : vector<8x32xf32>
    %170 = tpu.matmul %169, %157, %cst_45 {dimension_numbers = #tpu.dot_dimension_numbers<[1], [0], [0], [1], [0, 0, 1, 1], [], []>} : vector<8x8xbf16>, vector<8x32xbf16>, vector<8x32xf32> -> vector<8x32xf32>
    %171 = tpu.concatenate %122, %138, %154, %170 in 1 : vector<8x32xf32>, vector<8x32xf32>, vector<8x32xf32>, vector<8x32xf32> -> vector<8x128xf32>
    %172 = tpu.concatenate %103, %171 in 0 : vector<8x128xf32>, vector<8x128xf32> -> vector<16x128xf32>
    %173 = arith.truncf %172 : vector<16x128xf32> to vector<16x128xbf16>
    %c0_46 = arith.constant 0 : index
    %c0_47 = arith.constant 0 : index
    %174 = vector.load %arg5[%c0_46, %c0_47] : memref<128x64xf32, #tpu.memory_space<vmem>>, vector<128x64xf32>
    %175 = arith.truncf %174 : vector<128x64xf32> to vector<128x64xbf16>
    %cst_48 = arith.constant dense<0.000000e+00> : vector<16x64xf32>
    %176 = tpu.matmul %173, %175, %cst_48 {dimension_numbers = #tpu.dot_dimension_numbers<[1], [0], [0], [1], [0, 0, 1, 1], [], []>} : vector<16x128xbf16>, vector<128x64xbf16>, vector<16x64xf32> -> vector<16x64xf32>
    %177 = arith.addf %1, %176 : vector<16x64xf32>
    %c0_49 = arith.constant 0 : index
    %c0_50 = arith.constant 0 : index
    %178 = vector.load %arg6[%c0_49, %c0_50] : memref<1x64xf32, #tpu.memory_space<vmem>>, vector<1x64xf32>
    %179 = vector.broadcast %178 : vector<1x64xf32> to vector<16x64xf32>
    %180 = arith.addf %177, %179 : vector<16x64xf32>
    %c0_51 = arith.constant 0 : index
    %c0_52 = arith.constant 0 : index
    %181 = vector.load %arg7[%c0_51, %c0_52] : memref<1x64xf32, #tpu.memory_space<vmem>>, vector<1x64xf32>
    %c0_53 = arith.constant 0 : index
    %c0_54 = arith.constant 0 : index
    %182 = vector.load %arg8[%c0_53, %c0_54] : memref<1x64xf32, #tpu.memory_space<vmem>>, vector<1x64xf32>
    %cst_55 = arith.constant dense<0.000000e+00> : vector<16xf32>
    %183 = vector.multi_reduction <add>, %180, %cst_55 [1] : vector<16x64xf32> to vector<16xf32>
    %184 = vector.shape_cast %183 : vector<16xf32> to vector<16x1xf32>
    %cst_56 = arith.constant 6.400000e+01 : f32
    %185 = vector.broadcast %cst_56 : f32 to vector<16x1xf32>
    %186 = arith.divf %184, %185 : vector<16x1xf32>
    %187 = vector.broadcast %186 : vector<16x1xf32> to vector<16x64xf32>
    %188 = arith.subf %180, %187 : vector<16x64xf32>
    %189 = arith.mulf %188, %188 : vector<16x64xf32>
    %cst_57 = arith.constant dense<0.000000e+00> : vector<16xf32>
    %190 = vector.multi_reduction <add>, %189, %cst_57 [1] : vector<16x64xf32> to vector<16xf32>
    %191 = vector.shape_cast %190 : vector<16xf32> to vector<16x1xf32>
    %cst_58 = arith.constant 6.400000e+01 : f32
    %192 = vector.broadcast %cst_58 : f32 to vector<16x1xf32>
    %193 = arith.divf %191, %192 : vector<16x1xf32>
    %cst_59 = arith.constant 9.99999974E-6 : f32
    %194 = vector.broadcast %cst_59 : f32 to vector<16x1xf32>
    %195 = arith.addf %193, %194 : vector<16x1xf32>
    %196 = math.rsqrt %195 : vector<16x1xf32>
    %197 = vector.broadcast %196 : vector<16x1xf32> to vector<16x64xf32>
    %198 = arith.mulf %188, %197 : vector<16x64xf32>
    %199 = vector.broadcast %181 : vector<1x64xf32> to vector<16x64xf32>
    %200 = arith.mulf %198, %199 : vector<16x64xf32>
    %201 = vector.broadcast %182 : vector<1x64xf32> to vector<16x64xf32>
    %202 = arith.addf %200, %201 : vector<16x64xf32>
    %203 = arith.truncf %202 : vector<16x64xf32> to vector<16x64xbf16>
    %c0_60 = arith.constant 0 : index
    %c0_61 = arith.constant 0 : index
    %204 = vector.load %arg9[%c0_60, %c0_61] : memref<64x128xf32, #tpu.memory_space<vmem>>, vector<64x128xf32>
    %205 = arith.truncf %204 : vector<64x128xf32> to vector<64x128xbf16>
    %cst_62 = arith.constant dense<0.000000e+00> : vector<16x128xf32>
    %206 = tpu.matmul %203, %205, %cst_62 {dimension_numbers = #tpu.dot_dimension_numbers<[1], [0], [0], [1], [0, 0, 1, 1], [], []>} : vector<16x64xbf16>, vector<64x128xbf16>, vector<16x128xf32> -> vector<16x128xf32>
    %c0_63 = arith.constant 0 : index
    %c0_64 = arith.constant 0 : index
    %207 = vector.load %arg10[%c0_63, %c0_64] : memref<1x128xf32, #tpu.memory_space<vmem>>, vector<1x128xf32>
    %208 = vector.broadcast %207 : vector<1x128xf32> to vector<16x128xf32>
    %209 = arith.addf %206, %208 : vector<16x128xf32>
    %cst_65 = arith.constant 5.000000e-01 : f32
    %210 = vector.broadcast %cst_65 : f32 to vector<16x128xf32>
    %211 = arith.mulf %210, %209 : vector<16x128xf32>
    %cst_66 = arith.constant 4.471500e-02 : f32
    %212 = vector.broadcast %cst_66 : f32 to vector<16x128xf32>
    %213 = arith.mulf %212, %209 : vector<16x128xf32>
    %214 = arith.mulf %213, %209 : vector<16x128xf32>
    %215 = arith.mulf %214, %209 : vector<16x128xf32>
    %216 = arith.addf %209, %215 : vector<16x128xf32>
    %cst_67 = arith.constant 0.797884583 : f32
    %217 = vector.broadcast %cst_67 : f32 to vector<16x128xf32>
    %218 = arith.mulf %217, %216 : vector<16x128xf32>
    %219 = math.tanh %218 : vector<16x128xf32>
    %cst_68 = arith.constant 1.000000e+00 : f32
    %220 = vector.broadcast %cst_68 : f32 to vector<16x128xf32>
    %221 = arith.addf %220, %219 : vector<16x128xf32>
    %222 = arith.mulf %211, %221 : vector<16x128xf32>
    %223 = arith.truncf %222 : vector<16x128xf32> to vector<16x128xbf16>
    %c0_69 = arith.constant 0 : index
    %c0_70 = arith.constant 0 : index
    %224 = vector.load %arg11[%c0_69, %c0_70] : memref<128x64xf32, #tpu.memory_space<vmem>>, vector<128x64xf32>
    %225 = arith.truncf %224 : vector<128x64xf32> to vector<128x64xbf16>
    %cst_71 = arith.constant dense<0.000000e+00> : vector<16x64xf32>
    %226 = tpu.matmul %223, %225, %cst_71 {dimension_numbers = #tpu.dot_dimension_numbers<[1], [0], [0], [1], [0, 0, 1, 1], [], []>} : vector<16x128xbf16>, vector<128x64xbf16>, vector<16x64xf32> -> vector<16x64xf32>
    %c0_72 = arith.constant 0 : index
    %c0_73 = arith.constant 0 : index
    %227 = vector.load %arg12[%c0_72, %c0_73] : memref<1x64xf32, #tpu.memory_space<vmem>>, vector<1x64xf32>
    %228 = vector.broadcast %227 : vector<1x64xf32> to vector<16x64xf32>
    %229 = arith.addf %226, %228 : vector<16x64xf32>
    %230 = arith.addf %180, %229 : vector<16x64xf32>
    %231 = vector.shape_cast %230 : vector<16x64xf32> to vector<2x8x64xf32>
    %c0_74 = arith.constant 0 : index
    %c0_75 = arith.constant 0 : index
    %c0_76 = arith.constant 0 : index
    %232 = vector.load %arg13[%c0_74, %c0_75, %c0_76] : memref<2x8x64xf32, #tpu.memory_space<vmem>>, vector<2x8x64xf32>
    tpu.vector_store %arg13[%c0_74, %c0_75, %c0_76], %231 {strides = array<i32>} : memref<2x8x64xf32, #tpu.memory_space<vmem>>, vector<2x8x64xf32>,
    return
  }
  func.func @transform_0(%arg0: i32) -> (i32, i32, i32) {
    %c0_i32 = arith.constant 0 : i32
    %c0_i32_0 = arith.constant 0 : i32
    %c0_i32_1 = arith.constant 0 : i32
    return %arg0, %c0_i32, %c0_i32_0 : i32, i32, i32
  }
  func.func @transform_1(%arg0: i32) -> (i32, i32) {
    %c0_i32 = arith.constant 0 : i32
    %c0_i32_0 = arith.constant 0 : i32
    %c0_i32_1 = arith.constant 0 : i32
    return %c0_i32, %c0_i32_0 : i32, i32
  }
  func.func @transform_2(%arg0: i32) -> (i32, i32) {
    %c0_i32 = arith.constant 0 : i32
    %c0_i32_0 = arith.constant 0 : i32
    %c0_i32_1 = arith.constant 0 : i32
    return %c0_i32, %c0_i32_0 : i32, i32
  }
  func.func @transform_3(%arg0: i32) -> (i32, i32) {
    %c0_i32 = arith.constant 0 : i32
    %c0_i32_0 = arith.constant 0 : i32
    %c0_i32_1 = arith.constant 0 : i32
    return %c0_i32, %c0_i32_0 : i32, i32
  }
  func.func @transform_4(%arg0: i32) -> (i32, i32) {
    %c0_i32 = arith.constant 0 : i32
    %c0_i32_0 = arith.constant 0 : i32
    %c0_i32_1 = arith.constant 0 : i32
    return %c0_i32, %c0_i32_0 : i32, i32
  }
  func.func @transform_5(%arg0: i32) -> (i32, i32) {
    %c0_i32 = arith.constant 0 : i32
    %c0_i32_0 = arith.constant 0 : i32
    %c0_i32_1 = arith.constant 0 : i32
    return %c0_i32, %c0_i32_0 : i32, i32
  }
  func.func @transform_6(%arg0: i32) -> (i32, i32) {
    %c0_i32 = arith.constant 0 : i32
    %c0_i32_0 = arith.constant 0 : i32
    %c0_i32_1 = arith.constant 0 : i32
    return %c0_i32, %c0_i32_0 : i32, i32
  }
  func.func @transform_7(%arg0: i32) -> (i32, i32) {
    %c0_i32 = arith.constant 0 : i32
    %c0_i32_0 = arith.constant 0 : i32
    %c0_i32_1 = arith.constant 0 : i32
    return %c0_i32, %c0_i32_0 : i32, i32
  }
  func.func @transform_8(%arg0: i32) -> (i32, i32) {
    %c0_i32 = arith.constant 0 : i32
    %c0_i32_0 = arith.constant 0 : i32
    %c0_i32_1 = arith.constant 0 : i32
    return %c0_i32, %c0_i32_0 : i32, i32
  }
  func.func @transform_9(%arg0: i32) -> (i32, i32) {
    %c0_i32 = arith.constant 0 : i32
    %c0_i32_0 = arith.constant 0 : i32
    %c0_i32_1 = arith.constant 0 : i32
    return %c0_i32, %c0_i32_0 : i32, i32
  }
  func.func @transform_10(%arg0: i32) -> (i32, i32) {
    %c0_i32 = arith.constant 0 : i32
    %c0_i32_0 = arith.constant 0 : i32
    %c0_i32_1 = arith.constant 0 : i32
    return %c0_i32, %c0_i32_0 : i32, i32
  }
  func.func @transform_11(%arg0: i32) -> (i32, i32) {
    %c0_i32 = arith.constant 0 : i32
    %c0_i32_0 = arith.constant 0 : i32
    %c0_i32_1 = arith.constant 0 : i32
    return %c0_i32, %c0_i32_0 : i32, i32
  }
  func.func @transform_12(%arg0: i32) -> (i32, i32, i32) {
    %c0_i32 = arith.constant 0 : i32
    %c0_i32_0 = arith.constant 0 : i32
    %c0_i32_1 = arith.constant 0 : i32
    return %arg0, %c0_i32, %c0_i32_0 : i32, i32, i32
  }
}

</mosaic_0001>

<bundles_post_ra>
// kernel: tpu_custom_call.1
= control target key start
LH: loop header
LB: loop body
LE: loop exit
PB: predicated region body
PF: predicated region fallthrough
CT: control target
= control target key end

     0   :  { %vm47_vm0 = vcmask 523264   ;;  %s2278_s0 = inlined_call_operand.vmem [shape: f32[2,8,64], index: 0, kind: input, shape index: {}]   ;;  %s2279_s1 = inlined_call_operand.vmem [shape: f32[1,64], index: 1, kind: input, shape index: {}]   ;;  %s2280_s2 = inlined_call_operand.vmem [shape: f32[1,64], index: 2, kind: input, shape index: {}]   ;;  %s2281_s3 = inlined_call_operand.vmem [shape: f32[64,384], index: 3, kind: input, shape index: {}]   ;;  %s2282_s4 = inlined_call_operand.vmem [shape: f32[128,64], index: 4, kind: input, shape index: {}]   ;;  %s2283_s5 = inlined_call_operand.vmem [shape: f32[1,64], index: 5, kind: input, shape index: {}]   ;;  %s2284_s6 = inlined_call_operand.vmem [shape: f32[1,64], index: 6, kind: input, shape index: {}]   ;;  %s2285_s7 = inlined_call_operand.vmem [shape: f32[1,64], index: 7, kind: input, shape index: {}]   ;;  %s2286_s8 = inlined_call_operand.vmem [shape: f32[64,128], index: 8, kind: input, shape index: {}]   ;;  %s2287_s9 = inlined_call_operand.vmem [shape: f32[1,128], index: 9, kind: input, shape index: {}]   ;;  %s2288_s10 = inlined_call_operand.vmem [shape: f32[128,64], index: 10, kind: input, shape index: {}]   ;;  %s2289_s11 = inlined_call_operand.vmem [shape: f32[1,64], index: 11, kind: input, shape index: {}]   ;;  %s2290_s12 = inlined_call_operand.hbm [shape: f32[2,8,64], index: 12, kind: output, shape index: {}]  }
   0x1   :  { %v1837_v0 = vld [vmem:[%s2278_s0] sm:$0xff]  ;;  %v1842_v1 = vld [vmem:[%s2278_s0 + $0x8] sm:$0xff] }
   0x2   :  { %17 = vsyncpa [#allocation3], 0  ;;  %v48_v2 = vsel %vm47_vm0, %v1837_v0, 0.0  ;;  %v51_v3 = vsel %vm47_vm0, %v1842_v1, 0.0  ;;  %v111_v14 = vld [vmem:[%s2281_s3 + $0x98] sm:$0xff]  ;;  %v114_v15 = vld [vmem:[%s2281_s3 + $0xb0] sm:$0xff] }
   0x3   :  { %49 = vadd.xlane.f32.xlu0 %v48_v2  ;;  %v110_v16 = vld [vmem:[%s2281_s3 + $0x90] sm:$0xff]  ;;  %v126_v17 = vpack.c.bf16 %v114_v15, %v111_v14  ;;  %v1760_v18 = vmov 0.0   ;;  %v113_v19 = vld [vmem:[%s2281_s3 + $0xa8] sm:$0xff]  ;;  %v112_v20 = vld [vmem:[%s2281_s3 + $0xa0] sm:$0xff]  ;;  %v1761_v22 = vmov 0   ;;  %vm1762_vm1 = vmmov 0  }
   0x4   :  { %1510 = vmatprep.subr.bf16.mxu1 %v1760_v18  ;;  %v115_v21 = vld [vmem:[%s2281_s3 + $0xb8] sm:$0xff]  ;;  %163 = vmatprep.mubr.bf16.mxu0 %v1761_v22  ;;  %v125_v23 = vpack.c.bf16 %v113_v19, %v110_v16  ;;  %v105_v25 = vld [vmem:[%s2281_s3 + $0x68] sm:$0xff]  ;;  %v108_v26 = vld [vmem:[%s2281_s3 + $0x80] sm:$0xff]  ;;  %vm220_vm2 = vcmask 261120   ;;  %vm283_vm3 = vcmask 1043456   ;;  %vm267_vm4 = vcmask 64512  }
   0x5   :  { %v127_v24 = vpack.c.bf16 %v115_v21, %v112_v20  ;;  %v104_v27 = vld [vmem:[%s2281_s3 + $0x60] sm:$0xff]  ;;  %1518 = vmatprep.mubr.msk.bf16.mxu1 %vm1762_vm1, %v1760_v18  ;;  %139 = vmatprep.subr.bf16.mxu0 %v126_v17  ;;  %v123_v28 = vpack.c.bf16 %v108_v26, %v105_v25  ;;  %v107_v29 = vld [vmem:[%s2281_s3 + $0x78] sm:$0xff]  ;;  %v106_v30 = vld [vmem:[%s2281_s3 + $0x70] sm:$0xff]  ;;  %s1765_s19 = smov 64   ;;  %vm674_vm5 = vcmask 785408  }
   0x6   :  { %v109_v31 = vld [vmem:[%s2281_s3 + $0x88] sm:$0xff]  ;;  %140 = vmatpush1.bf16.msra.mxu0 %v125_v23  ;;  %v122_v32 = vpack.c.bf16 %v107_v29, %v104_v27  ;;  %v99_v34 = vld [vmem:[%s2281_s3 + $0x38] sm:$0xff]  ;;  %v102_v35 = vld [vmem:[%s2281_s3 + $0x50] sm:$0xff] }
   0x7   :  { %52 = vadd.xlane.f32.xlu0 %v51_v3  ;;  %1511 = vmatpush3.bf16.msra.mxu1 %v127_v24  ;;  %v124_v33 = vpack.c.bf16 %v109_v31, %v106_v30  ;;  %v98_v36 = vld [vmem:[%s2281_s3 + $0x30] sm:$0xff]  ;;  %v120_v37 = vpack.c.bf16 %v102_v35, %v99_v34  ;;  %v101_v38 = vld [vmem:[%s2281_s3 + $0x48] sm:$0xff]  ;;  %v100_v39 = vld [vmem:[%s2281_s3 + $0x40] sm:$0xff] }
   0x8   :  { %141 = vmatprep.subr.bf16.mxu0 %v123_v28  ;;  %1512 = vmatprep.subr.bf16.mxu1 %v1760_v18  ;;  %v103_v40 = vld [vmem:[%s2281_s3 + $0x58] sm:$0xff]  ;;  %v93_v41 = vld [vmem:[%s2281_s3 + $0x8] sm:$0xff]  ;;  %v96_v42 = vld [vmem:[%s2281_s3 + $0x20] sm:$0xff]  ;;  %v119_v43 = vpack.c.bf16 %v101_v38, %v98_v36 }
   0x9   :  { %v121_v44 = vpack.c.bf16 %v103_v40, %v100_v39  ;;  %v92_v45 = vld [vmem:[%s2281_s3] sm:$0xff]  ;;  %v117_v46 = vpack.c.bf16 %v96_v42, %v93_v41  ;;  %v95_v47 = vld [vmem:[%s2281_s3 + $0x18] sm:$0xff]  ;;  %v94_v48 = vld [vmem:[%s2281_s3 + $0x10] sm:$0xff] }
   0xa   :  { %142 = vmatpush1.bf16.msra.mxu0 %v122_v32  ;;  %v97_v49 = vld [vmem:[%s2281_s3 + $0x28] sm:$0xff]  ;;  %v116_v50 = vpack.c.bf16 %v95_v47, %v92_v45  ;;  %v1424_v60 = vld [vmem:[%s2279_s1] ss:$0 sm:$0xff]  ;;  %s1763_s1 = smov 96  }
   0xb   :  { %1513 = vmatpush3.bf16.msra.mxu1 %v124_v33  ;;  %143 = vmatprep.subr.bf16.mxu0 %v120_v37  ;;  %v118_v51 = vpack.c.bf16 %v97_v49, %v94_v48  ;;  %v1425_v2 = vld [vmem:[%s2280_s2] ss:$0 sm:$0xff]  ;;  %s1764_s2 = smov 32  }
   0xc   :  { %1514 = vmatprep.subr.bf16.mxu1 %v1760_v18 }
   0xe   :  { %144 = vmatpush1.bf16.msra.mxu0 %v119_v43 }
   0xf   :  { %1515 = vmatpush3.bf16.msra.mxu1 %v121_v44  ;;  %145 = vmatprep.subr.bf16.mxu0 %v117_v46 }
  0x10   :  { %1516 = vmatprep.subr.bf16.mxu1 %v1760_v18 }
  0x12   :  { %146 = vmatpush1.bf16.msra.mxu0 %v116_v50 }
  0x13   :  { %1517 = vmatpush3.bf16.msra.mxu1 %v118_v51  ;;  %1522 = vmatprep.subr.bf16.mxu0 %v1760_v18 }
  0x14   :  { %1540 = vmatprep.subr.bf16.mxu1 %v1760_v18 }
  0x8c   :  { %v50_v4 = vpop.xlane.xlu0 %49 }
  0x8d   :  { %v55_v5 = vmul.f32 0.015625, %v50_v4 }
  0x8f   :  { %v1849_v6 = vsub.f32 %v1837_v0, %v55_v5 }
  0x90   :  { %v53_v7 = vpop.xlane.xlu0 %52 }
  0x91   :  { %v56_v8 = vmul.f32 0.015625, %v53_v7  ;;  %v59_v9 = vmul.f32 %v1849_v6, %v1849_v6 }
  0x93   :  { %v1854_v10 = vsub.f32 %v1842_v1, %v56_v8  ;;  %v61_v11 = vsel %vm47_vm0, %v59_v9, 0.0 }
  0x94   :  { %62 = vadd.xlane.f32.xlu1 %v61_v11 }
  0x95   :  { %v60_v12 = vmul.f32 %v1854_v10, %v1854_v10 }
  0x97   :  { %v64_v13 = vsel %vm47_vm0, %v60_v12, 0.0 }
  0x98   :  { %65 = vadd.xlane.f32.xlu1 %v64_v13 }
 0x11d   :  { %v63_v52 = vpop.xlane.xlu1 %62 }
 0x11e   :  { %v67_v53 = vmul.f32 0.015625, %v63_v52 }
 0x120   :  { %v69_v54 = vadd.f32 1e-05, %v67_v53 }
 0x121   :  { %v66_v55 = vpop.xlane.xlu1 %65 }
 0x122   :  { %1694 = vrsqrt.f32 %v69_v54  ;;  %v68_v56 = vmul.f32 0.015625, %v66_v55 }
 0x124   :  { %v70_v57 = vadd.f32 1e-05, %v68_v56 }
 0x126   :  { %1696 = vrsqrt.f32 %v70_v57 }
 0x12f   :  { %v1695_v58 = vpop.eup %1694 }
 0x130   :  { %v73_v59 = vmul.f32 %v1695_v58, %v1849_v6 }
 0x132   :  { %v81_v63 = vmul.f32 %v1424_v60, %v73_v59 }
 0x133   :  { %v1697_v61 = vpop.eup %1696 }
 0x134   :  { %v74_v62 = vmul.f32 %v1697_v61, %v1854_v10  ;;  %v89_v4 = vadd.f32 %v1425_v2, %v81_v63 }
 0x136   :  { %v82_v3 = vmul.f32 %v1424_v60, %v74_v62 }
 0x138   :  { %v90_v5 = vadd.f32 %v1425_v2, %v82_v3 }
 0x13a   :  { %v91_v7 = vpack.c.bf16 %v90_v5, %v89_v4 }
 0x13c   :  { %1426 = vmatmul.mubr.msk.bf16.vlgmr.msra.gmra.mxu0 %vm47_vm0, %v91_v7  ;;  %1519 = vmatmul.mubr.msk.bf16.vlgmr.msra.gmra.mxu1 %vm47_vm0, %v91_v7 }
 0x13d   :  { %1524 = vmatprep.mubr.msk.bf16.mxu0 %vm1762_vm1, %v1760_v18  ;;  %1542 = vmatprep.mubr.msk.bf16.mxu1 %vm1762_vm1, %v1760_v18 }
 0x1fc   :  { %v165_v6 = vpop.f32.mrf.mxu0  ;;  %v208_v8 = vpop.f32.mrf.mxu1 }
 0x1fd   :  { %v215_v19 = vmul.f32 0.17677669, %v165_v6 }
 0x1fe   :  { %v167_v9 = vpop.f32.mrf.mxu0  ;;  %v1520_v10 = vpop.f32.mrf.mxu1 }
 0x200   :  { %v169_v11 = vpop.f32.mrf.mxu0  ;;  %v211_v12 = vpop.f32.mrf.mxu1 }
 0x201   :  { %v216_v17 = vmul.f32 0.17677669, %v169_v11  ;;  %v1956_v20 = vpack.c.bf16 %v211_v12, %v208_v8 }
 0x202   :  { %v171_v13 = vpop.f32.mrf.mxu0  ;;  %v1521_v14 = vpop.f32.mrf.mxu1 }
 0x203   :  { %v218_v15 = vpack.c.bf16 %v171_v13, %v167_v9  ;;  %v217_v21 = vpack.c.bf16 %v216_v17, %v215_v19  ;;  %v285_v22 = vsel %vm283_vm3, %v1956_v20, 0 }
 0x205   :  { %v225_v16 = vsel %vm220_vm2, %v218_v15, 0  ;;  %v677_v28 = vrot.slane %v218_v15, 4  ;;  %v676_v34 = vrot.slane %v217_v21, 4 }
 0x206   :  { %1523 = vmatpush3.bf16.xpose.msra.mxu0 %v225_v16 }
 0x207   :  { %1528 = vmatprep.subr.bf16.mxu0 %v1760_v18  ;;  %v682_v48 = vsel %vm220_vm2, %v677_v28, 0 }
 0x20d   :  { %1525 = vmatmul.mubr.msk.bf16.vlgmr.msra.gmra.mxu0 %vm220_vm2, %v217_v21 }
 0x20e   :  { %1529 = vmatpush3.bf16.msra.mxu0 %v285_v22  ;;  %1530 = vmatprep.mubr.msk.bf16.mxu0 %vm1762_vm1, %v1760_v18 }
 0x20f   :  { %1534 = vmatprep.subr.bf16.mxu0 %v1760_v18 }
 0x2cd   :  { %v261_v23 = vpop.f32.mrf.mxu0 }
 0x2ce   :  { %v268_v24 = vsel %vm267_vm4, %v261_v23, -inf }
 0x2cf   :  { %269 = vmax.xlane.f32.xlu0 %v268_v24  ;;  %v1526_v25 = vpop.f32.mrf.mxu0 }
 0x2d1   :  { %v264_v26 = vpop.f32.mrf.mxu0 }
 0x2d3   :  { %v1527_v27 = vpop.f32.mrf.mxu0 }
 0x2e5   :  { %331 = vrot.lane.b32.xlu0 %v218_v15, %s1763_s1 }
 0x2e9   :  { %552 = vrot.lane.b32.xlu0 %v218_v15, %s1764_s2 }
 0x2ed   :  { %785 = vrot.lane.b32.xlu0 %v677_v28, %s1763_s1 }
 0x2f1   :  { %895 = vrot.lane.b32.xlu0 %v677_v28, %s1765_s19 }
 0x2f5   :  { %1005 = vrot.lane.b32.xlu0 %v677_v28, %s1764_s2 }
 0x358   :  { %v270_v29 = vpop.xlane.xlu0 %269 }
 0x359   :  { %v271_v30 = vsub.f32 %v261_v23, %v270_v29 }
 0x35b   :  { %v272_v31 = vmul.f32 1.442695, %v271_v30 }
 0x35c   :  { %v332_v38 = vpop.permute.xlu0 %331 }
 0x35d   :  { %1698 = vpow2.f32 %v272_v31  ;;  %v337_v41 = vsel %vm220_vm2, %v332_v38, 0 }
 0x360   :  { %v553_v44 = vpop.permute.xlu0 %552 }
 0x361   :  { %v558_v46 = vsel %vm220_vm2, %v553_v44, 0 }
 0x364   :  { %v786_v49 = vpop.permute.xlu0 %785 }
 0x365   :  { %v791_v50 = vsel %vm220_vm2, %v786_v49, 0 }
 0x368   :  { %v896_v51 = vpop.permute.xlu0 %895 }
 0x369   :  { %v901_v53 = vsel %vm220_vm2, %v896_v51, 0 }
 0x36a   :  { %v1699_v32 = vpop.eup %1698 }
 0x36b   :  { %v274_v33 = vsel %vm267_vm4, %v1699_v32, 0.0 }
 0x36c   :  { %275 = vadd.xlane.f32.xlu1 %v274_v33  ;;  %v1006_v54 = vpop.permute.xlu0 %1005 }
 0x36d   :  { %v1011_v56 = vsel %vm220_vm2, %v1006_v54, 0 }
 0x37d   :  { %328 = vrot.lane.b32.xlu1 %v217_v21, %s1763_s1 }
 0x381   :  { %442 = vrot.lane.b32.xlu1 %v218_v15, %s1765_s19 }
 0x385   :  { %440 = vrot.lane.b32.xlu1 %v217_v21, %s1765_s19 }
 0x389   :  { %550 = vrot.lane.b32.xlu1 %v217_v21, %s1764_s2 }
 0x38d   :  { %783 = vrot.lane.b32.xlu1 %v676_v34, %s1763_s1 }
 0x391   :  { %893 = vrot.lane.b32.xlu1 %v676_v34, %s1765_s19 }
 0x395   :  { %1003 = vrot.lane.b32.xlu1 %v676_v34, %s1764_s2 }
 0x3f5   :  { %v276_v35 = vpop.xlane.xlu1 %275 }
 0x3f6   :  { %1700 = vrcp.f32 %v276_v35 }
 0x3f9   :  { %v329_v40 = vpop.permute.xlu1 %328 }
 0x3fd   :  { %v443_v42 = vpop.permute.xlu1 %442 }
 0x3fe   :  { %v448_v43 = vsel %vm220_vm2, %v443_v42, 0 }
 0x401   :  { %v441_v45 = vpop.permute.xlu1 %440 }
 0x403   :  { %v1701_v36 = vpop.eup %1700 }
 0x404   :  { %v278_v37 = vmul.f32 %v1701_v36, %v1699_v32 }
 0x405   :  { %v551_v47 = vpop.permute.xlu1 %550 }
 0x406   :  { %v279_v39 = vpack.c.bf16 %v278_v37, %v278_v37 }
 0x408   :  { %1531 = vmatmul.mubr.msk.bf16.vlgmr.msra.gmra.mxu0 %vm267_vm4, %v279_v39 }
 0x409   :  { %1535 = vmatpush3.bf16.xpose.msra.mxu0 %v337_v41  ;;  %1536 = vmatprep.mubr.msk.bf16.mxu0 %vm1762_vm1, %v1760_v18  ;;  %v784_v52 = vpop.permute.xlu1 %783 }
 0x40a   :  { %1546 = vmatprep.subr.bf16.mxu0 %v1760_v18 }
 0x40d   :  { %v894_v55 = vpop.permute.xlu1 %893 }
 0x410   :  { %1537 = vmatmul.mubr.msk.bf16.vlgmr.msra.gmra.mxu0 %vm220_vm2, %v329_v40 }
 0x411   :  { %1547 = vmatpush3.bf16.xpose.msra.mxu0 %v448_v43  ;;  %1548 = vmatprep.mubr.msk.bf16.mxu0 %vm1762_vm1, %v1760_v18  ;;  %v1004_v57 = vpop.permute.xlu1 %1003 }
 0x412   :  { %1558 = vmatprep.subr.bf16.mxu0 %v1760_v18 }
 0x418   :  { %1549 = vmatmul.mubr.msk.bf16.vlgmr.msra.gmra.mxu0 %vm220_vm2, %v441_v45 }
 0x419   :  { %1559 = vmatpush3.bf16.xpose.msra.mxu0 %v558_v46  ;;  %1560 = vmatprep.mubr.msk.bf16.mxu0 %vm1762_vm1, %v1760_v18 }
 0x41a   :  { %1570 = vmatprep.subr.bf16.mxu0 %v1760_v18 }
 0x420   :  { %1561 = vmatmul.mubr.msk.bf16.vlgmr.msra.gmra.mxu0 %vm220_vm2, %v551_v47 }
 0x421   :  { %1571 = vmatpush3.bf16.xpose.msra.mxu0 %v682_v48  ;;  %1572 = vmatprep.mubr.msk.bf16.mxu0 %vm1762_vm1, %v1760_v18 }
 0x422   :  { %1582 = vmatprep.subr.bf16.mxu0 %v1760_v18 }
 0x428   :  { %1573 = vmatmul.mubr.msk.bf16.vlgmr.msra.gmra.mxu0 %vm220_vm2, %v676_v34 }
 0x429   :  { %1583 = vmatpush3.bf16.xpose.msra.mxu0 %v791_v50  ;;  %1584 = vmatprep.mubr.msk.bf16.mxu0 %vm1762_vm1, %v1760_v18 }
 0x42a   :  { %1594 = vmatprep.subr.bf16.mxu0 %v1760_v18 }
 0x430   :  { %1585 = vmatmul.mubr.msk.bf16.vlgmr.msra.gmra.mxu0 %vm220_vm2, %v784_v52 }
 0x431   :  { %1595 = vmatpush3.bf16.xpose.msra.mxu0 %v901_v53  ;;  %1596 = vmatprep.mubr.msk.bf16.mxu0 %vm1762_vm1, %v1760_v18 }
 0x432   :  { %1606 = vmatprep.subr.bf16.mxu0 %v1760_v18 }
 0x438   :  { %1597 = vmatmul.mubr.msk.bf16.vlgmr.msra.gmra.mxu0 %vm220_vm2, %v894_v55 }
 0x439   :  { %1607 = vmatpush3.bf16.xpose.msra.mxu0 %v1011_v56  ;;  %1608 = vmatprep.mubr.msk.bf16.mxu0 %vm1762_vm1, %v1760_v18 }
 0x43a   :  { %1618 = vmatprep.subr.bf16.mxu0 %v1760_v18 }
 0x440   :  { %1609 = vmatmul.mubr.msk.bf16.vlgmr.msra.gmra.mxu0 %vm220_vm2, %v1004_v57 }
 0x441   :  { %1634 = vmatprep.mubr.msk.bf16.mxu0 %vm1762_vm1, %v1760_v18 }
 0x4c8   :  { %v2016_v58 = vpop.f32.mrf.mxu0 }
 0x4ca   :  { %v1532_v59 = vpop.f32.mrf.mxu0 }
 0x4cc   :  { %v324_v60 = vpop.f32.mrf.mxu0 }
 0x4ce   :  { %v1533_v61 = vpop.f32.mrf.mxu0 }
 0x4cf   :  { %v736_v61 = vrot.slane %v1956_v20, 4 }
 0x4d0   :  { %v373_v62 = vpop.f32.mrf.mxu0 }
 0x4d1   :  { %v379_v63 = vsel %vm267_vm4, %v373_v62, -inf }
 0x4d2   :  { %380 = vmax.xlane.f32.xlu0 %v379_v63  ;;  %v1538_v2 = vpop.f32.mrf.mxu0 }
 0x4d4   :  { %v376_v3 = vpop.f32.mrf.mxu0 }
 0x4d6   :  { %v1539_v4 = vpop.f32.mrf.mxu0 }
 0x4d8   :  { %v484_v5 = vpop.f32.mrf.mxu0 }
 0x4d9   :  { %v490_v7 = vsel %vm267_vm4, %v484_v5, -inf }
 0x4da   :  { %491 = vmax.xlane.f32.xlu1 %v490_v7  ;;  %v1550_v6 = vpop.f32.mrf.mxu0 }
 0x4dc   :  { %v487_v8 = vpop.f32.mrf.mxu0 }
 0x4de   :  { %v1551_v9 = vpop.f32.mrf.mxu0 }
 0x4e0   :  { %v594_v10 = vpop.f32.mrf.mxu0 }
 0x4e1   :  { %v600_v11 = vsel %vm267_vm4, %v594_v10, -inf }
 0x4e2   :  { %601 = vmax.xlane.f32.xlu0 %v600_v11  ;;  %v1562_v12 = vpop.f32.mrf.mxu0 }
 0x4e4   :  { %v597_v13 = vpop.f32.mrf.mxu0 }
 0x4e6   :  { %v1563_v14 = vpop.f32.mrf.mxu0 }
 0x4e8   :  { %v718_v15 = vpop.f32.mrf.mxu0 }
 0x4e9   :  { %v724_v16 = vsel %vm267_vm4, %v718_v15, -inf }
 0x4ea   :  { %725 = vmax.xlane.f32.xlu0 %v724_v16  ;;  %v1574_v17 = vpop.f32.mrf.mxu0 }
 0x4ec   :  { %v721_v19 = vpop.f32.mrf.mxu0 }
 0x4ee   :  { %v1575_v21 = vpop.f32.mrf.mxu0 }
 0x4f0   :  { %v827_v22 = vpop.f32.mrf.mxu0 }
 0x4f1   :  { %v833_v23 = vsel %vm267_vm4, %v827_v22, -inf }
 0x4f2   :  { %834 = vmax.xlane.f32.xlu0 %v833_v23  ;;  %v1586_v24 = vpop.f32.mrf.mxu0 }
 0x4f4   :  { %v830_v25 = vpop.f32.mrf.mxu0 }
 0x4f6   :  { %v1587_v26 = vpop.f32.mrf.mxu0 }
 0x4f8   :  { %v937_v27 = vpop.f32.mrf.mxu0 }
 0x4f9   :  { %v943_v28 = vsel %vm267_vm4, %v937_v27, -inf }
 0x4fa   :  { %944 = vmax.xlane.f32.xlu1 %v943_v28  ;;  %v1598_v29 = vpop.f32.mrf.mxu0 }
 0x4fc   :  { %v940_v30 = vpop.f32.mrf.mxu0 }
 0x4fe   :  { %v1599_v31 = vpop.f32.mrf.mxu0 }
 0x500   :  { %v1047_v32 = vpop.f32.mrf.mxu0 }
 0x501   :  { %v1053_v33 = vsel %vm267_vm4, %v1047_v32, -inf }
 0x502   :  { %1054 = vmax.xlane.f32.xlu0 %v1053_v33  ;;  %v1610_v34 = vpop.f32.mrf.mxu0 }
 0x504   :  { %v1050_v35 = vpop.f32.mrf.mxu0 }
 0x506   :  { %v1611_v36 = vpop.f32.mrf.mxu0 }
 0x50b   :  { %392 = vrot.lane.b32.xlu1 %v1956_v20, %s1763_s1 }
 0x518   :  { %502 = vrot.lane.b32.xlu0 %v1956_v20, %s1765_s19 }
 0x55b   :  { %v381_v37 = vpop.xlane.xlu0 %380 }
 0x55c   :  { %v382_v38 = vsub.f32 %v373_v62, %v381_v37 }
 0x55e   :  { %v383_v39 = vmul.f32 1.442695, %v382_v38 }
 0x560   :  { %1702 = vpow2.f32 %v383_v39 }
 0x563   :  { %v492_v40 = vpop.xlane.xlu1 %491 }
 0x564   :  { %v493_v41 = vsub.f32 %v484_v5, %v492_v40 }
 0x566   :  { %v494_v42 = vmul.f32 1.442695, %v493_v41 }
 0x568   :  { %1704 = vpow2.f32 %v494_v42 }
 0x56b   :  { %v602_v43 = vpop.xlane.xlu0 %601 }
 0x56c   :  { %v603_v44 = vsub.f32 %v594_v10, %v602_v43 }
 0x56d   :  { %v1703_v45 = vpop.eup %1702 }
 0x56e   :  { %v604_v46 = vmul.f32 1.442695, %v603_v44  ;;  %v385_v47 = vsel %vm267_vm4, %v1703_v45, 0.0 }
 0x56f   :  { %386 = vadd.xlane.f32.xlu1 %v385_v47 }
 0x570   :  { %1706 = vpow2.f32 %v604_v46 }
 0x573   :  { %v726_v48 = vpop.xlane.xlu0 %725 }
 0x574   :  { %v727_v49 = vsub.f32 %v718_v15, %v726_v48 }
 0x575   :  { %v1705_v50 = vpop.eup %1704 }
 0x576   :  { %v728_v51 = vmul.f32 1.442695, %v727_v49  ;;  %v496_v52 = vsel %vm267_vm4, %v1705_v50, 0.0 }
 0x577   :  { %497 = vadd.xlane.f32.xlu0 %v496_v52 }
 0x578   :  { %1708 = vpow2.f32 %v728_v51 }
 0x57b   :  { %v835_v2 = vpop.xlane.xlu0 %834 }
 0x57c   :  { %v836_v3 = vsub.f32 %v827_v22, %v835_v2 }
 0x57d   :  { %v2031_v53 = vpop.eup %1706 }
 0x57e   :  { %v606_v54 = vsel %vm267_vm4, %v2031_v53, 0.0  ;;  %v837_v5 = vmul.f32 1.442695, %v836_v3 }
 0x57f   :  { %607 = vadd.xlane.f32.xlu1 %v606_v54  ;;  %v1143_v54 = vld [vmem:[%s2282_s4 + $0x70] sm:$0xff] }
 0x583   :  { %v945_v55 = vpop.xlane.xlu1 %944 }
 0x584   :  { %v946_v62 = vsub.f32 %v937_v27, %v945_v55  ;;  %v1144_v55 = vld [vmem:[%s2282_s4 + $0x78] sm:$0xff] }
 0x585   :  { %v2035_v56 = vpop.eup %1708 }
 0x586   :  { %v730_v57 = vsel %vm267_vm4, %v2035_v56, 0.0  ;;  %v947_v63 = vmul.f32 1.442695, %v946_v62  ;;  %v1140_v62 = vld [vmem:[%s2282_s4 + $0x58] sm:$0xff] }
 0x587   :  { %v393_v59 = vpop.permute.xlu1 %392  ;;  %731 = vadd.xlane.f32.xlu0 %v730_v57  ;;  %v1152_v57 = vpack.c.bf16 %v1144_v55, %v1143_v54 }
 0x588   :  { %v398_v60 = vsel %vm283_vm3, %v393_v59, 0  ;;  %1710 = vpow2.f32 %v947_v63  ;;  %v1142_v59 = vld [vmem:[%s2282_s4 + $0x68] sm:$0xff] }
 0x589   :  { %1541 = vmatpush3.bf16.msra.mxu1 %v398_v60  ;;  %1712 = vpow2.f32 %v837_v5  ;;  %1619 = vmatpush3.bf16.msra.mxu0 %v1152_v57 }
 0x58a   :  { %1552 = vmatprep.subr.bf16.mxu1 %v1760_v18  ;;  %1620 = vmatprep.subr.bf16.mxu0 %v1760_v18 }
 0x58b   :  { %v1055_v4 = vpop.xlane.xlu0 %1054 }
 0x58c   :  { %v1056_v7 = vsub.f32 %v1047_v32, %v1055_v4  ;;  %v741_v32 = vsel %vm283_vm3, %v736_v61, 0 }
 0x58e   :  { %v1057_v6 = vmul.f32 1.442695, %v1056_v7 }
 0x58f   :  { %v503_v14 = vpop.permute.xlu0 %502 }
 0x590   :  { %845 = vrot.lane.b32.xlu1 %v736_v61, %s1763_s1  ;;  %1714 = vpow2.f32 %v1057_v6  ;;  %v508_v22 = vsel %vm283_vm3, %v503_v14, 0 }
 0x595   :  { %v2045_v8 = vpop.eup %1710 }
 0x596   :  { %v949_v9 = vsel %vm267_vm4, %v2045_v8, 0.0  ;;  %v1713_v10 = vpop.eup %1712 }
 0x597   :  { %v839_v11 = vsel %vm267_vm4, %v1713_v10, 0.0 }
 0x59d   :  { %612 = vrot.lane.b32.xlu0 %v1956_v20, %s1764_s2  ;;  %v2050_v20 = vpop.eup %1714 }
 0x59e   :  { %v1059_v12 = vsel %vm267_vm4, %v2050_v20, 0.0 }
 0x5b4   :  { %950 = vadd.xlane.f32.xlu1 %v949_v9 }
 0x5bc   :  { %840 = vadd.xlane.f32.xlu0 %v839_v11 }
 0x5c0   :  { %1060 = vadd.xlane.f32.xlu0 %v1059_v12 }
 0x5c5   :  { %1065 = vrot.lane.b32.xlu1 %v736_v61, %s1764_s2 }
 0x5d6   :  { %955 = vrot.lane.b32.xlu0 %v736_v61, %s1765_s19  ;;  %v1139_v61 = vld [vmem:[%s2282_s4 + $0x50] sm:$0xff] }
 0x5d7   :  { %v1150_v63 = vpack.c.bf16 %v1140_v62, %v1139_v61 }
 0x5f8   :  { %v387_v13 = vpop.xlane.xlu1 %386 }
 0x5f9   :  { %1716 = vrcp.f32 %v387_v13 }
 0x600   :  { %v498_v15 = vpop.xlane.xlu0 %497 }
 0x601   :  { %1718 = vrcp.f32 %v498_v15 }
 0x606   :  { %v1717_v16 = vpop.eup %1716 }
 0x607   :  { %v389_v17 = vmul.f32 %v1717_v16, %v1703_v45 }
 0x608   :  { %v608_v19 = vpop.xlane.xlu1 %607 }
 0x609   :  { %1720 = vrcp.f32 %v608_v19  ;;  %v390_v21 = vpack.c.bf16 %v389_v17, %v389_v17  ;;  %v1137_v17 = vld [vmem:[%s2282_s4 + $0x40] sm:$0xff]  ;;  %v1138_v19 = vld [vmem:[%s2282_s4 + $0x48] sm:$0xff] }
 0x60b   :  { %1543 = vmatmul.mubr.msk.bf16.vlgmr.msra.gmra.mxu1 %vm267_vm4, %v390_v21  ;;  %v1149_v21 = vpack.c.bf16 %v1138_v19, %v1137_v17 }
 0x60c   :  { %1553 = vmatpush3.bf16.msra.mxu1 %v508_v22  ;;  %1554 = vmatprep.mubr.msk.bf16.mxu1 %vm1762_vm1, %v1760_v18  ;;  %v846_v35 = vpop.permute.xlu1 %845  ;;  %v1135_v22 = vld [vmem:[%s2282_s4 + $0x30] sm:$0xff] }
 0x60d   :  { %1564 = vmatprep.subr.bf16.mxu1 %v1760_v18  ;;  %v851_v37 = vsel %vm283_vm3, %v846_v35, 0 }
 0x60e   :  { %v1719_v23 = vpop.eup %1718 }
 0x60f   :  { %v500_v24 = vmul.f32 %v1719_v23, %v1705_v50  ;;  %v1136_v23 = vld [vmem:[%s2282_s4 + $0x38] sm:$0xff] }
 0x610   :  { %v732_v25 = vpop.xlane.xlu0 %731 }
 0x611   :  { %1722 = vrcp.f32 %v732_v25  ;;  %v501_v26 = vpack.c.bf16 %v500_v24, %v500_v24  ;;  %v1148_v24 = vpack.c.bf16 %v1136_v23, %v1135_v22  ;;  %v1133_v25 = vld [vmem:[%s2282_s4 + $0x20] sm:$0xff]  ;;  %v1256_v23 = vld [vmem:[%s2286_s8 + $0x30] sm:$0xff] }
 0x613   :  { %1555 = vmatmul.mubr.msk.bf16.vlgmr.msra.gmra.mxu1 %vm267_vm4, %v501_v26  ;;  %v1134_v26 = vld [vmem:[%s2282_s4 + $0x28] sm:$0xff] }
 0x614   :  { %v613_v27 = vpop.permute.xlu0 %612  ;;  %1566 = vmatprep.mubr.msk.bf16.mxu1 %vm1762_vm1, %v1760_v18 }
 0x615   :  { %v618_v28 = vsel %vm283_vm3, %v613_v27, 0  ;;  %v1147_v27 = vpack.c.bf16 %v1134_v26, %v1133_v25  ;;  %v1254_v26 = vld [vmem:[%s2286_s8 + $0x20] sm:$0xff] }
 0x616   :  { %v1721_v29 = vpop.eup %1720  ;;  %1565 = vmatpush3.bf16.msra.mxu1 %v618_v28 }
 0x617   :  { %1576 = vmatprep.subr.bf16.mxu1 %v1760_v18  ;;  %v610_v30 = vmul.f32 %v1721_v29, %v2031_v53  ;;  %v1131_v29 = vld [vmem:[%s2282_s4 + $0x10] sm:$0xff] }
 0x619   :  { %v611_v31 = vpack.c.bf16 %v610_v30, %v610_v30  ;;  %v1132_v30 = vld [vmem:[%s2282_s4 + $0x18] sm:$0xff] }
 0x61b   :  { %1567 = vmatmul.mubr.msk.bf16.vlgmr.msra.gmra.mxu1 %vm267_vm4, %v611_v31 }
 0x61c   :  { %1577 = vmatpush3.bf16.msra.mxu1 %v741_v32  ;;  %1578 = vmatprep.mubr.msk.bf16.mxu1 %vm1762_vm1, %v1760_v18  ;;  %v1146_v32 = vpack.c.bf16 %v1132_v30, %v1131_v29  ;;  %v1252_v29 = vld [vmem:[%s2286_s8 + $0x10] sm:$0xff]  ;;  %v1253_v30 = vld [vmem:[%s2286_s8 + $0x18] sm:$0xff] }
 0x61d   :  { %1588 = vmatprep.subr.bf16.mxu1 %v1760_v18 }
 0x61e   :  { %v1723_v33 = vpop.eup %1722 }
 0x61f   :  { %v734_v34 = vmul.f32 %v1723_v33, %v2035_v56  ;;  %v1141_v56 = vld [vmem:[%s2282_s4 + $0x60] sm:$0xff] }
 0x620   :  { %v1151_v60 = vpack.c.bf16 %v1142_v59, %v1141_v56 }
 0x621   :  { %v735_v36 = vpack.c.bf16 %v734_v34, %v734_v34 }
 0x622   :  { %1621 = vmatpush3.bf16.msra.mxu0 %v1151_v60 }
 0x623   :  { %1579 = vmatmul.mubr.msk.bf16.vlgmr.msra.gmra.mxu1 %vm267_vm4, %v735_v36  ;;  %1622 = vmatprep.subr.bf16.mxu0 %v1760_v18  ;;  %v1129_v36 = vld [vmem:[%s2282_s4] sm:$0xff] }
 0x624   :  { %1589 = vmatpush3.bf16.msra.mxu1 %v851_v37  ;;  %1590 = vmatprep.mubr.msk.bf16.mxu1 %vm1762_vm1, %v1760_v18  ;;  %v1130_v37 = vld [vmem:[%s2282_s4 + $0x8] sm:$0xff] }
 0x625   :  { %1600 = vmatprep.subr.bf16.mxu1 %v1760_v18 }
 0x626   :  { %1623 = vmatpush3.bf16.msra.mxu0 %v1150_v63 }
 0x627   :  { %1624 = vmatprep.subr.bf16.mxu0 %v1760_v18 }
 0x62a   :  { %1625 = vmatpush3.bf16.msra.mxu0 %v1149_v21 }
 0x62b   :  { %1626 = vmatprep.subr.bf16.mxu0 %v1760_v18 }
 0x62e   :  { %1627 = vmatpush3.bf16.msra.mxu0 %v1148_v24  ;;  %v1257_v24 = vld [vmem:[%s2286_s8 + $0x38] sm:$0xff] }
 0x62f   :  { %1628 = vmatprep.subr.bf16.mxu0 %v1760_v18  ;;  %v1261_v25 = vpack.c.bf16 %v1257_v24, %v1256_v23 }
 0x632   :  { %1629 = vmatpush3.bf16.msra.mxu0 %v1147_v27  ;;  %v1255_v27 = vld [vmem:[%s2286_s8 + $0x28] sm:$0xff] }
 0x633   :  { %1630 = vmatprep.subr.bf16.mxu0 %v1760_v18 }
 0x636   :  { %1631 = vmatpush3.bf16.msra.mxu0 %v1146_v32  ;;  %v1250_v32 = vld [vmem:[%s2286_s8] sm:$0xff] }
 0x637   :  { %1632 = vmatprep.subr.bf16.mxu0 %v1760_v18 }
 0x63d   :  { %v951_v39 = vpop.xlane.xlu1 %950 }
 0x641   :  { %v1066_v48 = vpop.permute.xlu1 %1065 }
 0x642   :  { %v1071_v51 = vsel %vm283_vm3, %v1066_v48, 0 }
 0x645   :  { %v841_v38 = vpop.xlane.xlu0 %840 }
 0x646   :  { %1724 = vrcp.f32 %v841_v38  ;;  %v1145_v38 = vpack.c.bf16 %v1130_v37, %v1129_v36 }
 0x647   :  { %1726 = vrcp.f32 %v951_v39 }
 0x648   :  { %1633 = vmatpush3.bf16.msra.mxu0 %v1145_v38 }
 0x649   :  { %v1061_v40 = vpop.xlane.xlu0 %1060 }
 0x64a   :  { %1728 = vrcp.f32 %v1061_v40 }
 0x64d   :  { %v956_v43 = vpop.permute.xlu0 %955 }
 0x64e   :  { %v961_v46 = vsel %vm283_vm3, %v956_v43, 0 }
 0x653   :  { %v1725_v41 = vpop.eup %1724 }
 0x654   :  { %v843_v42 = vmul.f32 %v1725_v41, %v1713_v10  ;;  %v1727_v45 = vpop.eup %1726 }
 0x655   :  { %v953_v47 = vmul.f32 %v1727_v45, %v2045_v8 }
 0x656   :  { %v844_v44 = vpack.c.bf16 %v843_v42, %v843_v42 }
 0x657   :  { %v954_v49 = vpack.c.bf16 %v953_v47, %v953_v47  ;;  %v1729_v50 = vpop.eup %1728 }
 0x658   :  { %1591 = vmatmul.mubr.msk.bf16.vlgmr.msra.gmra.mxu1 %vm267_vm4, %v844_v44  ;;  %v1063_v52 = vmul.f32 %v1729_v50, %v2050_v20 }
 0x659   :  { %1601 = vmatpush3.bf16.msra.mxu1 %v961_v46  ;;  %1602 = vmatprep.mubr.msk.bf16.mxu1 %vm1762_vm1, %v1760_v18 }
 0x65a   :  { %1612 = vmatprep.subr.bf16.mxu1 %v1760_v18  ;;  %v1064_v53 = vpack.c.bf16 %v1063_v52, %v1063_v52 }
 0x660   :  { %1603 = vmatmul.mubr.msk.bf16.vlgmr.msra.gmra.mxu1 %vm267_vm4, %v954_v49 }
 0x661   :  { %1613 = vmatpush3.bf16.msra.mxu1 %v1071_v51  ;;  %1614 = vmatprep.mubr.msk.bf16.mxu1 %vm1762_vm1, %v1760_v18 }
 0x662   :  { %1638 = vmatprep.subr.bf16.mxu1 %v1760_v18 }
 0x668   :  { %1615 = vmatmul.mubr.msk.bf16.vlgmr.msra.gmra.mxu1 %vm267_vm4, %v1064_v53 }
 0x669   :  { %1646 = vmatprep.mubr.msk.bf16.mxu1 %vm1762_vm1, %v1760_v18  ;;  %1639 = vmatpush3.bf16.msra.mxu1 %v1261_v25 }
 0x66a   :  { %1640 = vmatprep.subr.bf16.mxu1 %v1760_v18 }
 0x6cb   :  { %v434_v2 = vpop.f32.mrf.mxu1 }
 0x6cd   :  { %v1544_v3 = vpop.f32.mrf.mxu1 }
 0x6cf   :  { %v437_v4 = vpop.f32.mrf.mxu1 }
 0x6d1   :  { %v1545_v5 = vpop.f32.mrf.mxu1 }
 0x6d2   :  { %v1444_v5 = vld [vmem:[%s2283_s5] ss:$0 sm:$0xff]  ;;  %s1766_s5 = smov [#allocation2]  }
 0x6d3   :  { %v544_v7 = vpop.f32.mrf.mxu1 }
 0x6d5   :  { %v1556_v6 = vpop.f32.mrf.mxu1 }
 0x6d7   :  { %v547_v8 = vpop.f32.mrf.mxu1 }
 0x6d9   :  { %v1557_v9 = vpop.f32.mrf.mxu1 }
 0x6db   :  { %v654_v10 = vpop.f32.mrf.mxu1 }
 0x6dd   :  { %v1568_v11 = vpop.f32.mrf.mxu1 }
 0x6df   :  { %v657_v20 = vpop.f32.mrf.mxu1 }
 0x6e1   :  { %v1569_v12 = vpop.f32.mrf.mxu1 }
 0x6e3   :  { %v777_v13 = vpop.f32.mrf.mxu1 }
 0x6e5   :  { %v1580_v14 = vpop.f32.mrf.mxu1 }
 0x6e7   :  { %v780_v15 = vpop.f32.mrf.mxu1 }
 0x6e9   :  { %v1581_v16 = vpop.f32.mrf.mxu1 }
 0x718   :  { %v887_v28 = vpop.f32.mrf.mxu1 }
 0x719   :  { %v1679_v31 = vpack.i.bf16 %v887_v28, %v434_v2  ;;  %v1260_v28 = vpack.c.bf16 %v1255_v27, %v1254_v26 }
 0x71a   :  { %v1592_v33 = vpop.f32.mrf.mxu1 }
 0x71b   :  { %1680 = vrot.lane.b32.xlu1 %v1679_v31, %s1764_s2  ;;  %1641 = vmatpush3.bf16.msra.mxu1 %v1260_v28  ;;  %v1259_v31 = vpack.c.bf16 %v1253_v30, %v1252_v29  ;;  %v1251_v33 = vld [vmem:[%s2286_s8 + $0x8] sm:$0xff]  ;;  %s1413_s2 = sshll.u32 %s1766_s5, 4  ;;  %s1414_s2 = int_to_ptr.vmem [resolvable:$true] %s1413_s2 }
 0x71c   :  { %v890_v34 = vpop.f32.mrf.mxu1  ;;  %1642 = vmatprep.subr.bf16.mxu1 %v1760_v18  ;;  %p1743_p1 = scmp.lt.s32.totalorder %s1414_s2, %s1414_s2 }
 0x71d   :  { %v1258_v34 = vpack.c.bf16 %v1251_v33, %v1250_v32 }
 0x71e   :  { %v1593_v35 = vpop.f32.mrf.mxu1 }
 0x71f   :  { %1643 = vmatpush3.bf16.msra.mxu1 %v1259_v31 }
 0x720   :  { %v997_v39 = vpop.f32.mrf.mxu1  ;;  %1644 = vmatprep.subr.bf16.mxu1 %v1760_v18 }
 0x721   :  { %v1684_v40 = vpack.i.bf16 %v997_v39, %v544_v7 }
 0x722   :  { %v1604_v41 = vpop.f32.mrf.mxu1 }
 0x723   :  { %1685 = vrot.lane.b32.xlu1 %v1684_v40, %s1765_s19  ;;  %1645 = vmatpush3.bf16.msra.mxu1 %v1258_v34  ;;  %s1738_s19 = scalar_lea.vmem %s1414_s2, 256 }
 0x724   :  { %v1000_v42 = vpop.f32.mrf.mxu1  ;;  %1650 = vmatprep.subr.bf16.mxu1 %v1760_v18  ;;  %p1739_p0 = scmp.ne.s32.totalorder %s1414_s2, %s1738_s19  ;;  %p1744_p2 = scmp.lt.s32.totalorder %s1738_s19, %s1738_s19 }
 0x726   :  { %v1605_v43 = vpop.f32.mrf.mxu1  ;;  %p1745_p3 = por %p1744_p2, %p1743_p1 }
 0x727   :  { %v1445_v43 = vld [vmem:[%s2284_s6] ss:$0 sm:$0xff] }
 0x728   :  { %v1107_v44 = vpop.f32.mrf.mxu1  ;;  %p1746_p4 = pnand %p1745_p3, %p1739_p0 }
 0x729   :  { %v1689_v45 = vpack.i.bf16 %v1107_v44, %v654_v10 }
 0x72a   :  { %v1616_v46 = vpop.f32.mrf.mxu1 }
 0x72b   :  { %1690 = vrot.lane.b32.xlu1 %v1689_v45, %s1763_s1 }
 0x72c   :  { %v1110_v47 = vpop.f32.mrf.mxu1 }
 0x72d   :  { %v1446_v47 = vld [vmem:[%s2285_s7] ss:$0 sm:$0xff] }
 0x72e   :  { %v1617_v48 = vpop.f32.mrf.mxu1 }
 0x78d   :  { %v1681_v49 = vpop.permute.xlu1 %1680 }
 0x78e   :  { %v1683_v51 = vunpack.i.h.bf16 %v1681_v49  ;;  %v1682_v52 = vunpack.i.l.bf16 %v1681_v49 }
 0x790   :  { %v1125_v56 = vsel %vm220_vm2, %v777_v13, %v1683_v51  ;;  %v672_v57 = vsel %vm220_vm2, %v2016_v58, %v1682_v52  ;;  %v1346_v52 = vld [vmem:[%s2288_s10 + $0x70] sm:$0xff] }
 0x795   :  { %v1686_v50 = vpop.permute.xlu1 %1685 }
 0x796   :  { %v1688_v53 = vunpack.i.h.bf16 %v1686_v50  ;;  %v1687_v54 = vunpack.i.l.bf16 %v1686_v50 }
 0x798   :  { %v1126_v61 = vsel %vm47_vm0, %v1125_v56, %v1688_v53  ;;  %v673_v62 = vsel %vm47_vm0, %v672_v57, %v1687_v54  ;;  %v1347_v53 = vld [vmem:[%s2288_s10 + $0x78] sm:$0xff]  ;;  %v1345_v56 = vld [vmem:[%s2288_s10 + $0x68] sm:$0xff] }
 0x799   :  { %v1355_v54 = vpack.c.bf16 %v1347_v53, %v1346_v52 }
 0x79d   :  { %v1691_v55 = vpop.permute.xlu1 %1690 }
 0x79e   :  { %v1693_v59 = vunpack.i.h.bf16 %v1691_v55  ;;  %v1692_v60 = vunpack.i.l.bf16 %v1691_v55  ;;  %v1344_v55 = vld [vmem:[%s2288_s10 + $0x60] sm:$0xff] }
 0x79f   :  { %v1354_v57 = vpack.c.bf16 %v1345_v56, %v1344_v55 }
 0x7a0   :  { %v1127_v63 = vsel %vm674_vm5, %v1126_v61, %v1693_v59  ;;  %v675_v2 = vsel %vm674_vm5, %v673_v62, %v1692_v60  ;;  %v1342_v59 = vld [vmem:[%s2288_s10 + $0x50] sm:$0xff]  ;;  %v1343_v60 = vld [vmem:[%s2288_s10 + $0x58] sm:$0xff]  ;;  %v1340_v62 = vld [vmem:[%s2288_s10 + $0x40] sm:$0xff] }
 0x7a1   :  { %v1128_v3 = vpack.c.bf16 %v1127_v63, %v675_v2  ;;  %v1353_v61 = vpack.c.bf16 %v1343_v60, %v1342_v59  ;;  %v1341_v63 = vld [vmem:[%s2288_s10 + $0x48] sm:$0xff] }
 0x7a2   :  { %v1352_v2 = vpack.c.bf16 %v1341_v63, %v1340_v62 }
 0x7a3   :  { %1635 = vmatmul.mubr.bf16.vlgmr.msra.gmra.mxu0 %v1128_v3  ;;  %v1338_v3 = vld [vmem:[%s2288_s10 + $0x30] sm:$0xff] }
 0x863   :  { %v1187_v4 = vpop.f32.mrf.mxu0 }
 0x864   :  { %v1194_v7 = vadd.f32 %v1187_v4, %v1837_v0  ;;  %v1339_v4 = vld [vmem:[%s2288_s10 + $0x38] sm:$0xff] }
 0x865   :  { %v1636_v6 = vpop.f32.mrf.mxu0 }
 0x866   :  { %v2160_v8 = vadd.f32 %v1444_v5, %v1194_v7  ;;  %v1336_v7 = vld [vmem:[%s2288_s10 + $0x20] sm:$0xff]  ;;  %v1337_v6 = vld [vmem:[%s2288_s10 + $0x28] sm:$0xff] }
 0x867   :  { %v1190_v58 = vpop.f32.mrf.mxu0 }
 0x868   :  { %v1195_v9 = vadd.f32 %v1190_v58, %v1842_v1  ;;  %v1207_v10 = vsel %vm47_vm0, %v2160_v8, 0.0  ;;  %v1350_v58 = vpack.c.bf16 %v1337_v6, %v1336_v7 }
 0x869   :  { %1208 = vadd.xlane.f32.xlu1 %v1207_v10  ;;  %v1637_v11 = vpop.f32.mrf.mxu0  ;;  %v1335_v10 = vld [vmem:[%s2288_s10 + $0x18] sm:$0xff] }
 0x86a   :  { %v2165_v20 = vadd.f32 %v1444_v5, %v1195_v9  ;;  %v1351_v5 = vpack.c.bf16 %v1339_v4, %v1338_v3  ;;  %v1334_v9 = vld [vmem:[%s2288_s10 + $0x10] sm:$0xff] }
 0x86b   :  { %v1349_v11 = vpack.c.bf16 %v1335_v10, %v1334_v9 }
 0x86c   :  { %v1210_v12 = vsel %vm47_vm0, %v2165_v20, 0.0 }
 0x86d   :  { %1211 = vadd.xlane.f32.xlu0 %v1210_v12  ;;  %v1332_v12 = vld [vmem:[%s2288_s10] sm:$0xff] }
 0x8f2   :  { %v1209_v13 = vpop.xlane.xlu1 %1208 }
 0x8f3   :  { %v1213_v14 = vmul.f32 0.015625, %v1209_v13  ;;  %v1333_v13 = vld [vmem:[%s2288_s10 + $0x8] sm:$0xff] }
 0x8f5   :  { %v1215_v0 = vsub.f32 %v2160_v8, %v1213_v14  ;;  %v1348_v14 = vpack.c.bf16 %v1333_v13, %v1332_v12 }
 0x8f6   :  { %v1212_v15 = vpop.xlane.xlu0 %1211 }
 0x8f7   :  { %v1214_v16 = vmul.f32 0.015625, %v1212_v15  ;;  %v1217_v17 = vmul.f32 %v1215_v0, %v1215_v0 }
 0x8f9   :  { %v1216_v1 = vsub.f32 %v2165_v20, %v1214_v16  ;;  %v1219_v19 = vsel %vm47_vm0, %v1217_v17, 0.0 }
 0x8fa   :  { %1220 = vadd.xlane.f32.xlu0 %v1219_v19 }
 0x8fb   :  { %v1218_v21 = vmul.f32 %v1216_v1, %v1216_v1 }
 0x8fd   :  { %v1222_v22 = vsel %vm47_vm0, %v1218_v21, 0.0 }
 0x8fe   :  { %1223 = vadd.xlane.f32.xlu0 %v1222_v22 }
 0x983   :  { %v1221_v35 = vpop.xlane.xlu0 %1220 }
 0x984   :  { %v1225_v36 = vmul.f32 0.015625, %v1221_v35 }
 0x986   :  { %v1227_v37 = vadd.f32 1e-05, %v1225_v36 }
 0x987   :  { %v1224_v38 = vpop.xlane.xlu0 %1223 }
 0x988   :  { %1730 = vrsqrt.f32 %v1227_v37  ;;  %v1226_v39 = vmul.f32 0.015625, %v1224_v38 }
 0x98a   :  { %v1228_v40 = vadd.f32 1e-05, %v1226_v39 }
 0x98c   :  { %1732 = vrsqrt.f32 %v1228_v40  ;;  %v1449_v40 = vld [vmem:[%s2289_s11] ss:$0 sm:$0xff] }
 0x995   :  { %v1731_v41 = vpop.eup %1730 }
 0x996   :  { %v1231_v42 = vmul.f32 %v1731_v41, %v1215_v0  ;;  %v1447_v0 = vld [vmem:[%s2287_s9] ss:$0 sm:$0xff] }
 0x998   :  { %v1239_v46 = vmul.f32 %v1445_v43, %v1231_v42 }
 0x999   :  { %v1733_v44 = vpop.eup %1732 }
 0x99a   :  { %v1232_v45 = vmul.f32 %v1733_v44, %v1216_v1  ;;  %v1247_v49 = vadd.f32 %v1446_v47, %v1239_v46 }
 0x99c   :  { %v1240_v48 = vmul.f32 %v1445_v43, %v1232_v45 }
 0x99e   :  { %v1248_v50 = vadd.f32 %v1446_v47, %v1240_v48 }
 0x9a0   :  { %v1249_v51 = vpack.c.bf16 %v1248_v50, %v1247_v49 }
 0x9a2   :  { %1647 = vmatmul.mubr.msk.bf16.vlgmr.msra.gmra.mxu1 %vm47_vm0, %v1249_v51 }
 0x9a3   :  { %1666 = vmatprep.mubr.msk.bf16.mxu1 %vm1762_vm1, %v1760_v18  ;;  %1651 = vmatpush3.bf16.msra.mxu1 %v1355_v54 }
 0x9a4   :  { %1652 = vmatprep.subr.bf16.mxu1 %v1760_v18 }
 0x9a7   :  { %1653 = vmatpush3.bf16.msra.mxu1 %v1354_v57 }
 0x9a8   :  { %1654 = vmatprep.subr.bf16.mxu1 %v1760_v18 }
 0x9ab   :  { %1655 = vmatpush3.bf16.msra.mxu1 %v1353_v61 }
 0x9ac   :  { %1656 = vmatprep.subr.bf16.mxu1 %v1760_v18 }
 0x9af   :  { %1657 = vmatpush3.bf16.msra.mxu1 %v1352_v2 }
 0x9b0   :  { %1658 = vmatprep.subr.bf16.mxu1 %v1760_v18 }
 0x9b3   :  { %1659 = vmatpush3.bf16.msra.mxu1 %v1351_v5 }
 0x9b4   :  { %1660 = vmatprep.subr.bf16.mxu1 %v1760_v18 }
 0x9b7   :  { %1661 = vmatpush3.bf16.msra.mxu1 %v1350_v58 }
 0x9b8   :  { %1662 = vmatprep.subr.bf16.mxu1 %v1760_v18 }
 0x9bb   :  { %1663 = vmatpush3.bf16.msra.mxu1 %v1349_v11 }
 0x9bc   :  { %1664 = vmatprep.subr.bf16.mxu1 %v1760_v18 }
 0x9bf   :  { %1665 = vmatpush3.bf16.msra.mxu1 %v1348_v14 }
 0xa62   :  { %v1306_v15 = vpop.f32.mrf.mxu1 }
 0xa63   :  { %v1307_v16 = vadd.f32 %v1447_v0, %v1306_v15 }
 0xa64   :  { %v1648_v17 = vpop.f32.mrf.mxu1 }
 0xa65   :  { %v1315_v1 = vmul.f32 0.044715, %v1307_v16  ;;  %v1313_v34 = vmul.f32 0.5, %v1307_v16 }
 0xa66   :  { %v1309_v19 = vpop.f32.mrf.mxu1 }
 0xa67   :  { %v1317_v21 = vmul.f32 %v1315_v1, %v1307_v16  ;;  %v1310_v22 = vadd.f32 %v1447_v0, %v1309_v19 }
 0xa68   :  { %v1649_v23 = vpop.f32.mrf.mxu1 }
 0xa69   :  { %v1319_v24 = vmul.f32 %v1317_v21, %v1307_v16  ;;  %v1316_v25 = vmul.f32 0.044715, %v1310_v22  ;;  %v1314_v35 = vmul.f32 0.5, %v1310_v22 }
 0xa6b   :  { %v1321_v26 = vadd.f32 %v1319_v24, %v1307_v16  ;;  %v1318_v27 = vmul.f32 %v1316_v25, %v1310_v22 }
 0xa6d   :  { %v1323_v28 = vmul.f32 0.7978846, %v1321_v26  ;;  %v1320_v29 = vmul.f32 %v1318_v27, %v1310_v22 }
 0xa6f   :  { %1734 = vtanh.f32 %v1323_v28  ;;  %v1322_v18 = vadd.f32 %v1320_v29, %v1310_v22 }
 0xa71   :  { %v1324_v30 = vmul.f32 0.7978846, %v1322_v18 }
 0xa73   :  { %1736 = vtanh.f32 %v1324_v30 }
 0xa7c   :  { %v1735_v31 = vpop.eup %1734 }
 0xa7d   :  { %v1327_v32 = vadd.f32 1.0, %v1735_v31 }
 0xa7f   :  { %v1329_v37 = vmul.f32 %v1327_v32, %v1313_v34 }
 0xa80   :  { %v1737_v33 = vpop.eup %1736 }
 0xa81   :  { %v1328_v36 = vadd.f32 1.0, %v1737_v33 }
 0xa83   :  { %v1330_v38 = vmul.f32 %v1328_v36, %v1314_v35 }
 0xa85   :  { %v1331_v39 = vpack.c.bf16 %v1330_v38, %v1329_v37 }
 0xa87   :  { %1667 = vmatmul.mubr.bf16.vlgmr.msra.gmra.mxu1 %v1331_v39 }
 0xb47   :  { %v1397_v41 = vpop.f32.mrf.mxu1 }
 0xb48   :  { %v1398_v42 = vadd.f32 %v1449_v40, %v1397_v41 }
 0xb49   :  { %v1668_v43 = vpop.f32.mrf.mxu1 }
 0xb4a   :  { %v1404_v44 = vadd.f32 %v1398_v42, %v2160_v8 }
 0xb4b   :  { %v1400_v45 = vpop.f32.mrf.mxu1 }
 0xb4c   :  { %1406 = vst.msk [vmem:[#allocation2] sm:$0xff] %vm47_vm0, %v1404_v44  ;;  %v1401_v46 = vadd.f32 %v1449_v40, %v1400_v45 }
 0xb4d   :  { %v1669_v47 = vpop.f32.mrf.mxu1 }
 0xb4e   :  { %v1405_v48 = vadd.f32 %v1401_v46, %v2165_v20 }
 0xb50   :  { %1407 = vst.msk [vmem:[#allocation2 + $0x8] sm:$0xff] %vm47_vm0, %v1405_v48 }
 0xb51   :  { %1749 = shalt.err (!%p1746_p4)
}
 0xb52   :  { %s1767_s11 = smov 128   ;;  %s1768_s14 = smov 8  }
 0xb53   :  { %1419 = dma.vmem_to_hbm [thread:$0]  %s1414_s2, 256, %s2290_s12, [#allocation3], %s1767_s11, %s1767_s11, %s1768_s14  }
 0xb54   :  { %1758 = dma.done.wait [#allocation3], 256  }
 0xb55   :  { %1759 = vsyncadd [#allocation3], 4294967040 }
 0xb56   :  { %1423 = vsyncpa [#allocation3], 1 }

</bundles_post_ra>
